<compile_context>
chip_gen: v6e
topology: v6e:2x2x1
jax: 0.10.0
libtpu: 0.0.40
codegen_flags: <defaults>
</compile_context>

<pallas_src>
import functools

import numpy as np

import jax
import jax.numpy as jnp
from jax.experimental import pallas as pl
from jax.experimental.pallas import tpu as pltpu


def _block_kernel(top_ref, body_ref, bot_ref, dww_ref, s1_ref, b1_ref,
                  pw_ref, s2_ref, b2_ref, o_ref, xpad_ref, *,
                  th, W, Wo, Cin, Cout, stride, mm_dtype):
    """One (batch element, output-row block) step of the fused MobileNet block.

    top_ref : (1, 1, W, Cin)            top halo row (clamped in index_map)
    body_ref: (1, th*stride, W, Cin)    body input rows
    bot_ref : (1, 1, W, Cin)            bottom halo row (stride=1 only)
    dww_ref : (3, 3, Cin)               depthwise 3x3 filters
    s1/b1   : (1, Cin)                  folded BN1 scale / bias
    pw_ref  : (Cin, Cout)               pointwise 1x1 weights (bf16)
    s2/b2   : (1, Cout)                 folded BN2 scale / bias
    o_ref   : (1, th, Wo, Cout)         output row block
    xpad_ref: (th_in, W+2, Cin) f32     VMEM scratch: zero-padded input slab
    """
    f32 = jnp.float32
    hb = pl.program_id(1)
    n_hb = pl.num_programs(1)

    body_rows = th * stride                        # rows supplied by body_ref
    th_in = body_rows + (2 if stride == 1 else 1)  # rows of the padded slab

    # ---- assemble the zero-padded input slab in VMEM (pad fused in-kernel) ----
    # W zero padding: columns 0 and W+1.
    zcol = jnp.zeros((th_in, 1, Cin), f32)
    xpad_ref[:, 0:1, :] = zcol
    xpad_ref[:, W + 1:W + 2, :] = zcol
    # Top halo row: on the first row block it is the conv zero-padding row.
    top = top_ref[0].astype(f32)                   # (1, W, Cin)
    xpad_ref[0:1, 1:W + 1, :] = jnp.where(hb > 0, top, 0.0)
    # Body rows.
    xpad_ref[1:1 + body_rows, 1:W + 1, :] = body_ref[0].astype(f32)
    if stride == 1:
        # Bottom halo row: on the last row block it is the zero-padding row.
        bot = bot_ref[0].astype(f32)               # (1, W, Cin)
        xpad_ref[1 + body_rows:2 + body_rows, 1:W + 1, :] = jnp.where(
            hb < n_hb - 1, bot, 0.0)

    x = xpad_ref[...]                              # (th_in, W+2, Cin) f32

    # ---- depthwise 3x3 conv: 9 shifted multiply-accumulates on the VPU ----
    acc = jnp.zeros((th, Wo, Cin), f32)
    if stride == 1:
        for dh in range(3):
            for dw in range(3):
                w = dww_ref[dh, dw, :].astype(f32)          # (Cin,)
                patch = x[dh:dh + th, dw:dw + Wo, :]        # contiguous slices
                acc = acc + patch * w[None, None, :]
    else:
        # stride == 2: deinterleave W once into even/odd padded columns so each
        # tap is a contiguous slice (no strided sublane slices in the 9-tap loop).
        Wh = (W + 2) // 2
        xp = x.reshape(th_in, Wh, 2, Cin)
        halves = (xp[:, :, 0, :], xp[:, :, 1, :])           # even / odd columns
        for dh in range(3):
            for dw in range(3):
                src = halves[dw % 2]
                j0 = dw // 2
                patch = src[dh:dh + 2 * th - 1:2, j0:j0 + Wo, :]
                w = dww_ref[dh, dw, :].astype(f32)
                acc = acc + patch * w[None, None, :]

    # ---- BN1 (folded scale/bias) + ReLU ----
    y = jnp.maximum(acc * s1_ref[0][None, None, :] + b1_ref[0][None, None, :],
                    0.0)

    # ---- pointwise 1x1 conv == channel matmul on the MXU ----
    # bf16 operands (weights pre-cast in the wrapper), f32 accumulation.
    lhs = y.reshape(th * Wo, Cin).astype(mm_dtype)
    y2 = jnp.dot(lhs, pw_ref[...], preferred_element_type=f32)  # (th*Wo, Cout)

    # ---- BN2 + ReLU ----
    y2 = jnp.maximum(y2 * s2_ref[...] + b2_ref[...], 0.0)

    o_ref[0] = y2.reshape(th, Wo, Cout).astype(o_ref.dtype)


def _pick_row_block(Ho):
    """Pick an output-row tile that divides Ho (prefer sublane-friendly sizes)."""
    for cand in (16, 8):
        if Ho % cand == 0:
            return cand
    if Ho <= 32:
        return Ho
    best = 1
    for cand in range(2, 17):
        if Ho % cand == 0:
            best = cand
    return best


def mobilenet_block(x_nchw, params, stride=1, *, row_block=None,
                    matmul_dtype=jnp.bfloat16):
    """Fused depthwise-separable MobileNet block (inference-mode BatchNorm).

    x_nchw: (N, Cin, H, W) float32.  Returns (N, Cout, Ho, Wo) like the PyTorch
    module's forward pass.
    """
    if stride not in (1, 2):
        raise ValueError("stride must be 1 or 2")

    dw_w, bn1, pw_w, bn2 = (params["dw_w"], params["bn1"],
                            params["pw_w"], params["bn2"])
    eps = 1e-5
    # Fold BatchNorm (eval semantics, running stats) into scale/bias.
    s1 = bn1["gamma"] / jnp.sqrt(bn1["var"] + eps)
    b1 = bn1["beta"] - bn1["mean"] * s1
    s2 = bn2["gamma"] / jnp.sqrt(bn2["var"] + eps)
    b2 = bn2["beta"] - bn2["mean"] * s2

    N, Cin, H, W = x_nchw.shape
    Cout = pw_w.shape[0]
    if stride == 2 and (H % 2 or W % 2):
        raise ValueError("stride=2 path assumes even H and W")
    Ho = (H + 2 - 3) // stride + 1
    Wo = (W + 2 - 3) // stride + 1

    th = row_block if row_block is not None else _pick_row_block(Ho)
    if Ho % th != 0:
        raise ValueError(f"row_block={th} must divide Ho={Ho}")
    n_hb = Ho // th
    body_rows = th * stride
    th_in = body_rows + (2 if stride == 1 else 1)

    # NCHW -> NHWC (channels on the 128-lane axis).  No jnp.pad here: the conv
    # zero padding is materialised inside the kernel.
    x = jnp.transpose(x_nchw, (0, 2, 3, 1))

    # PyTorch depthwise weight (Cin, 1, 3, 3) -> (3, 3, Cin).
    dww = jnp.transpose(dw_w[:, 0, :, :], (1, 2, 0))
    # PyTorch pointwise weight (Cout, Cin, 1, 1) -> (Cin, Cout), cast for the MXU.
    pww = jnp.transpose(pw_w[:, :, 0, 0], (1, 0)).astype(matmul_dtype)

    s1 = s1.reshape(1, Cin).astype(jnp.float32)
    b1 = b1.reshape(1, Cin).astype(jnp.float32)
    s2 = s2.reshape(1, Cout).astype(jnp.float32)
    b2 = b2.reshape(1, Cout).astype(jnp.float32)

    # Halo-row index maps: clamp into range; the kernel masks the clamped rows
    # to zero at the image borders (that is the conv zero padding).
    def top_map(n, hb):
        return (n, jnp.maximum(hb * body_rows - 1, 0), 0, 0)

    def body_map(n, hb):
        return (n, hb, 0, 0)

    def bot_map(n, hb):
        return (n, jnp.minimum((hb + 1) * th, H - 1), 0, 0)

    def rep2(n, hb):
        return (0, 0)

    def rep3(n, hb):
        return (0, 0, 0)

    def out_map(n, hb):
        return (n, hb, 0, 0)

    kernel = functools.partial(_block_kernel, th=th, W=W, Wo=Wo, Cin=Cin,
                               Cout=Cout, stride=stride, mm_dtype=matmul_dtype)

    # Explicit VMEM budget: double-buffered in/out blocks + weights + padded
    # scratch slab + compute temporaries, with 2x headroom; clamped to
    # [32 MiB, 64 MiB] (64 MiB = v7x physical VMEM per core).
    isz = x.dtype.itemsize
    in_block = (body_rows + 2) * W * Cin * isz
    out_block = th * Wo * Cout * isz
    wgt = (9 * Cin + 2 * Cin + 2 * Cout) * 4 \
        + Cin * Cout * np.dtype(matmul_dtype).itemsize
    tmp = (th_in * (W + 2) * Cin + 2 * th * Wo * Cin + 2 * th * Wo * Cout) * 4
    vmem_bytes = int(min(64 * 1024 * 1024,
                         max(32 * 1024 * 1024,
                             2 * (2 * (in_block + out_block) + wgt + tmp))))

    out_nhwc = pl.pallas_call(
        kernel,
        out_shape=jax.ShapeDtypeStruct((N, Ho, Wo, Cout), x.dtype),
        grid_spec=pltpu.PrefetchScalarGridSpec(
            num_scalar_prefetch=0,
            grid=(N, n_hb),
            in_specs=[
                pl.BlockSpec((1, 1, W, Cin), top_map),           # top halo row
                pl.BlockSpec((1, body_rows, W, Cin), body_map),  # body rows
                pl.BlockSpec((1, 1, W, Cin), bot_map),           # bottom halo row
                pl.BlockSpec((3, 3, Cin), rep3),                 # depthwise weights
                pl.BlockSpec((1, Cin), rep2),                    # BN1 scale
                pl.BlockSpec((1, Cin), rep2),                    # BN1 bias
                pl.BlockSpec((Cin, Cout), rep2),                 # pointwise weights
                pl.BlockSpec((1, Cout), rep2),                   # BN2 scale
                pl.BlockSpec((1, Cout), rep2),                   # BN2 bias
            ],
            out_specs=pl.BlockSpec((1, th, Wo, Cout), out_map),
            scratch_shapes=[pltpu.VMEM((th_in, W + 2, Cin), jnp.float32)],
        ),
        compiler_params=pltpu.CompilerParams(
            dimension_semantics=("parallel", "parallel"),
            vmem_limit_bytes=vmem_bytes,
        ),
    )(x, x, x, dww, s1, b1, pww, s2, b2)

    # NHWC -> NCHW to match the PyTorch output convention.
    return jnp.transpose(out_nhwc, (0, 3, 1, 2))


def _reference(x_nchw, params, stride=1):
    """Pure-JAX reference (lax conv, f32) for correctness checking."""
    dw_w, bn1, pw_w, bn2 = (params["dw_w"], params["bn1"],
                            params["pw_w"], params["bn2"])
    eps = 1e-5
    Cin = x_nchw.shape[1]
    out = jax.lax.conv_general_dilated(
        x_nchw, dw_w, window_strides=(stride, stride), padding=((1, 1), (1, 1)),
        dimension_numbers=("NCHW", "OIHW", "NCHW"), feature_group_count=Cin)
    out = (out - bn1["mean"][None, :, None, None]) / jnp.sqrt(
        bn1["var"][None, :, None, None] + eps)
    out = out * bn1["gamma"][None, :, None, None] + bn1["beta"][None, :, None, None]
    out = jnp.maximum(out, 0.0)
    out = jax.lax.conv_general_dilated(
        out, pw_w, window_strides=(1, 1), padding=((0, 0), (0, 0)),
        dimension_numbers=("NCHW", "OIHW", "NCHW"))
    out = (out - bn2["mean"][None, :, None, None]) / jnp.sqrt(
        bn2["var"][None, :, None, None] + eps)
    out = out * bn2["gamma"][None, :, None, None] + bn2["beta"][None, :, None, None]
    return jnp.maximum(out, 0.0)


def _init_params(key, in_planes, out_planes):
    k = jax.random.split(key, 10)
    params = {
        "dw_w": 0.2 * jax.random.normal(k[0], (in_planes, 1, 3, 3), jnp.float32),
        "pw_w": 0.2 * jax.random.normal(k[1], (out_planes, in_planes, 1, 1),
                                        jnp.float32),
        "bn1": {
            "gamma": 1.0 + 0.1 * jax.random.normal(k[2], (in_planes,), jnp.float32),
            "beta": 0.1 * jax.random.normal(k[3], (in_planes,), jnp.float32),
            "mean": 0.1 * jax.random.normal(k[4], (in_planes,), jnp.float32),
            "var": jnp.abs(jax.random.normal(k[5], (in_planes,), jnp.float32)) + 0.5,
        },
        "bn2": {
            "gamma": 1.0 + 0.1 * jax.random.normal(k[6], (out_planes,), jnp.float32),
            "beta": 0.1 * jax.random.normal(k[7], (out_planes,), jnp.float32),
            "mean": 0.1 * jax.random.normal(k[8], (out_planes,), jnp.float32),
            "var": jnp.abs(jax.random.normal(k[9], (out_planes,), jnp.float32)) + 0.5,
        },
    }
    return params


if __name__ == "__main__":
    key = jax.random.PRNGKey(0)
    kx, kp = jax.random.split(key)

    N, Cin, H, W = 2, 4, 16, 16
    Cout = 8
    stride = 1

    x = jax.random.normal(kx, (N, Cin, H, W), jnp.float32)
    params = _init_params(kp, Cin, Cout)

    # row_block=8 -> 2 row blocks per image: exercises the halo / boundary logic.
    fwd = jax.jit(functools.partial(mobilenet_block, stride=stride, row_block=8))
    out = jax.block_until_ready(fwd(x, params))

    ref = jax.block_until_ready(_reference(x, params, stride=stride))
    assert out.shape == ref.shape, (out.shape, ref.shape)
    # bf16 MXU operands (f32 accumulation) -> compare with a bf16-level tolerance.
    assert jnp.allclose(out, ref, rtol=5e-2, atol=5e-2), (
        "mismatch vs reference; max abs err = %f"
        % float(jnp.max(jnp.abs(out - ref))))

    print("KERNEL_OK")
</pallas_src>

<mosaic_0001>
module attributes {stable_mosaic.version = 11 : i64} {
  func.func @_block_kernel(%arg0: i32, %arg1: i32, %arg2: memref<1x1x16x4xf32, #tpu.memory_space<vmem>>, %arg3: memref<1x8x16x4xf32, #tpu.memory_space<vmem>>, %arg4: memref<1x1x16x4xf32, #tpu.memory_space<vmem>>, %arg5: memref<3x3x4xf32, #tpu.memory_space<vmem>>, %arg6: memref<1x4xf32, #tpu.memory_space<vmem>>, %arg7: memref<1x4xf32, #tpu.memory_space<vmem>>, %arg8: memref<4x8xbf16, #tpu.memory_space<vmem>>, %arg9: memref<1x8xf32, #tpu.memory_space<vmem>>, %arg10: memref<1x8xf32, #tpu.memory_space<vmem>>, %arg11: memref<1x8x16x8xf32, #tpu.memory_space<vmem>>, %arg12: memref<10x18x4xf32, #tpu.memory_space<vmem>>) attributes {dimension_semantics = [#tpu.dimension_semantics<parallel>, #tpu.dimension_semantics<parallel>], iteration_bounds = array<i64: 2, 2>, scalar_prefetch = 0 : i64, scratch_operands = 1 : i64, tpu.core_type = #tpu.core_type<tc>, window_params = [{transform_indices = @transform_0, window_bounds = array<i64: 1, 1, 16, 4>}, {transform_indices = @transform_1, window_bounds = array<i64: 1, 8, 16, 4>}, {transform_indices = @transform_2, window_bounds = array<i64: 1, 1, 16, 4>}, {pipeline_mode = #tpu.pipeline_mode<synchronous>, transform_indices = @transform_3, window_bounds = array<i64: 3, 3, 4>}, {pipeline_mode = #tpu.pipeline_mode<synchronous>, transform_indices = @transform_4, window_bounds = array<i64: 1, 4>}, {pipeline_mode = #tpu.pipeline_mode<synchronous>, transform_indices = @transform_5, window_bounds = array<i64: 1, 4>}, {pipeline_mode = #tpu.pipeline_mode<synchronous>, transform_indices = @transform_6, window_bounds = array<i64: 4, 8>}, {pipeline_mode = #tpu.pipeline_mode<synchronous>, transform_indices = @transform_7, window_bounds = array<i64: 1, 8>}, {pipeline_mode = #tpu.pipeline_mode<synchronous>, transform_indices = @transform_8, window_bounds = array<i64: 1, 8>}, {transform_indices = @transform_9, window_bounds = array<i64: 1, 8, 16, 8>}]} {
    %cst = arith.constant 0.000000e+00 : f32
    %0 = vector.broadcast %cst : f32 to vector<10x1x4xf32>
    %c0 = arith.constant 0 : index
    %c0_0 = arith.constant 0 : index
    %c0_1 = arith.constant 0 : index
    %1 = vector.load %arg12[%c0, %c0_0, %c0_1] : memref<10x18x4xf32, #tpu.memory_space<vmem>>, vector<10x1x4xf32>
    tpu.vector_store %arg12[%c0, %c0_0, %c0_1], %0 {strides = array<i32>} : memref<10x18x4xf32, #tpu.memory_space<vmem>>, vector<10x1x4xf32>,
    %c0_2 = arith.constant 0 : index
    %c17 = arith.constant 17 : index
    %c0_3 = arith.constant 0 : index
    %2 = vector.load %arg12[%c0_2, %c17, %c0_3] : memref<10x18x4xf32, #tpu.memory_space<vmem>>, vector<10x1x4xf32>
    tpu.vector_store %arg12[%c0_2, %c17, %c0_3], %0 {strides = array<i32>} : memref<10x18x4xf32, #tpu.memory_space<vmem>>, vector<10x1x4xf32>,
    %c0_4 = arith.constant 0 : index
    %c0_5 = arith.constant 0 : index
    %c0_6 = arith.constant 0 : index
    %c0_7 = arith.constant 0 : index
    %3 = vector.load %arg2[%c0_4, %c0_5, %c0_6, %c0_7] : memref<1x1x16x4xf32, #tpu.memory_space<vmem>>, vector<1x1x16x4xf32>
    %4 = vector.shape_cast %3 : vector<1x1x16x4xf32> to vector<1x16x4xf32>
    %c0_i32 = arith.constant 0 : i32
    %5 = arith.cmpi sgt, %arg1, %c0_i32 : i32
    %cst_8 = arith.constant 0.000000e+00 : f32
    %6 = vector.broadcast %cst_8 : f32 to vector<1x16x4xf32>
    %7 = arith.select %5, %4, %6 : vector<1x16x4xf32>
    %c0_9 = arith.constant 0 : index
    %c1 = arith.constant 1 : index
    %c0_10 = arith.constant 0 : index
    %8 = vector.load %arg12[%c0_9, %c1, %c0_10] : memref<10x18x4xf32, #tpu.memory_space<vmem>>, vector<1x16x4xf32>
    tpu.vector_store %arg12[%c0_9, %c1, %c0_10], %7 {strides = array<i32>} : memref<10x18x4xf32, #tpu.memory_space<vmem>>, vector<1x16x4xf32>,
    %c0_11 = arith.constant 0 : index
    %c0_12 = arith.constant 0 : index
    %c0_13 = arith.constant 0 : index
    %c0_14 = arith.constant 0 : index
    %9 = vector.load %arg3[%c0_11, %c0_12, %c0_13, %c0_14] : memref<1x8x16x4xf32, #tpu.memory_space<vmem>>, vector<1x8x16x4xf32>
    %10 = vector.shape_cast %9 : vector<1x8x16x4xf32> to vector<8x16x4xf32>
    %c1_15 = arith.constant 1 : index
    %c1_16 = arith.constant 1 : index
    %c0_17 = arith.constant 0 : index
    %11 = vector.load %arg12[%c1_15, %c1_16, %c0_17] : memref<10x18x4xf32, #tpu.memory_space<vmem>>, vector<8x16x4xf32>
    tpu.vector_store %arg12[%c1_15, %c1_16, %c0_17], %10 {strides = array<i32>} : memref<10x18x4xf32, #tpu.memory_space<vmem>>, vector<8x16x4xf32>,
    %c0_18 = arith.constant 0 : index
    %c0_19 = arith.constant 0 : index
    %c0_20 = arith.constant 0 : index
    %c0_21 = arith.constant 0 : index
    %12 = vector.load %arg4[%c0_18, %c0_19, %c0_20, %c0_21] : memref<1x1x16x4xf32, #tpu.memory_space<vmem>>, vector<1x1x16x4xf32>
    %13 = vector.shape_cast %12 : vector<1x1x16x4xf32> to vector<1x16x4xf32>
    %c1_i32 = arith.constant 1 : i32
    %14 = arith.cmpi slt, %arg1, %c1_i32 : i32
    %cst_22 = arith.constant 0.000000e+00 : f32
    %15 = vector.broadcast %cst_22 : f32 to vector<1x16x4xf32>
    %16 = arith.select %14, %13, %15 : vector<1x16x4xf32>
    %c9 = arith.constant 9 : index
    %c1_23 = arith.constant 1 : index
    %c0_24 = arith.constant 0 : index
    %17 = vector.load %arg12[%c9, %c1_23, %c0_24] : memref<10x18x4xf32, #tpu.memory_space<vmem>>, vector<1x16x4xf32>
    tpu.vector_store %arg12[%c9, %c1_23, %c0_24], %16 {strides = array<i32>} : memref<10x18x4xf32, #tpu.memory_space<vmem>>, vector<1x16x4xf32>,
    %c0_25 = arith.constant 0 : index
    %c0_26 = arith.constant 0 : index
    %c0_27 = arith.constant 0 : index
    %18 = vector.load %arg12[%c0_25, %c0_26, %c0_27] : memref<10x18x4xf32, #tpu.memory_space<vmem>>, vector<10x18x4xf32>
    %cst_28 = arith.constant 0.000000e+00 : f32
    %19 = vector.broadcast %cst_28 : f32 to vector<8x16x4xf32>
    %c0_29 = arith.constant 0 : index
    %c0_30 = arith.constant 0 : index
    %c0_31 = arith.constant 0 : index
    %20 = vector.load %arg5[%c0_29, %c0_30, %c0_31] : memref<3x3x4xf32, #tpu.memory_space<vmem>>, vector<1x1x4xf32>
    %21 = vector.shape_cast %20 : vector<1x1x4xf32> to vector<4xf32>
    %22 = vector.extract_strided_slice %18 {offsets = [0, 0, 0], sizes = [8, 16, 4], strides = [1, 1, 1]} : vector<10x18x4xf32> to vector<8x16x4xf32>
    %23 = vector.shape_cast %21 : vector<4xf32> to vector<1x1x4xf32>
    %24 = vector.broadcast %23 : vector<1x1x4xf32> to vector<8x16x4xf32>
    %25 = arith.mulf %22, %24 : vector<8x16x4xf32>
    %26 = arith.addf %19, %25 : vector<8x16x4xf32>
    %c0_32 = arith.constant 0 : index
    %c1_33 = arith.constant 1 : index
    %c0_34 = arith.constant 0 : index
    %27 = vector.load %arg5[%c0_32, %c1_33, %c0_34] : memref<3x3x4xf32, #tpu.memory_space<vmem>>, vector<1x1x4xf32>
    %28 = vector.shape_cast %27 : vector<1x1x4xf32> to vector<4xf32>
    %29 = vector.extract_strided_slice %18 {offsets = [0, 1, 0], sizes = [8, 16, 4], strides = [1, 1, 1]} : vector<10x18x4xf32> to vector<8x16x4xf32>
    %30 = vector.shape_cast %28 : vector<4xf32> to vector<1x1x4xf32>
    %31 = vector.broadcast %30 : vector<1x1x4xf32> to vector<8x16x4xf32>
    %32 = arith.mulf %29, %31 : vector<8x16x4xf32>
    %33 = arith.addf %26, %32 : vector<8x16x4xf32>
    %c0_35 = arith.constant 0 : index
    %c2 = arith.constant 2 : index
    %c0_36 = arith.constant 0 : index
    %34 = vector.load %arg5[%c0_35, %c2, %c0_36] : memref<3x3x4xf32, #tpu.memory_space<vmem>>, vector<1x1x4xf32>
    %35 = vector.shape_cast %34 : vector<1x1x4xf32> to vector<4xf32>
    %36 = vector.extract_strided_slice %18 {offsets = [0, 2, 0], sizes = [8, 16, 4], strides = [1, 1, 1]} : vector<10x18x4xf32> to vector<8x16x4xf32>
    %37 = vector.shape_cast %35 : vector<4xf32> to vector<1x1x4xf32>
    %38 = vector.broadcast %37 : vector<1x1x4xf32> to vector<8x16x4xf32>
    %39 = arith.mulf %36, %38 : vector<8x16x4xf32>
    %40 = arith.addf %33, %39 : vector<8x16x4xf32>
    %c1_37 = arith.constant 1 : index
    %c0_38 = arith.constant 0 : index
    %c0_39 = arith.constant 0 : index
    %41 = vector.load %arg5[%c1_37, %c0_38, %c0_39] : memref<3x3x4xf32, #tpu.memory_space<vmem>>, vector<1x1x4xf32>
    %42 = vector.shape_cast %41 : vector<1x1x4xf32> to vector<4xf32>
    %43 = vector.extract_strided_slice %18 {offsets = [1, 0, 0], sizes = [8, 16, 4], strides = [1, 1, 1]} : vector<10x18x4xf32> to vector<8x16x4xf32>
    %44 = vector.shape_cast %42 : vector<4xf32> to vector<1x1x4xf32>
    %45 = vector.broadcast %44 : vector<1x1x4xf32> to vector<8x16x4xf32>
    %46 = arith.mulf %43, %45 : vector<8x16x4xf32>
    %47 = arith.addf %40, %46 : vector<8x16x4xf32>
    %c1_40 = arith.constant 1 : index
    %c1_41 = arith.constant 1 : index
    %c0_42 = arith.constant 0 : index
    %48 = vector.load %arg5[%c1_40, %c1_41, %c0_42] : memref<3x3x4xf32, #tpu.memory_space<vmem>>, vector<1x1x4xf32>
    %49 = vector.shape_cast %48 : vector<1x1x4xf32> to vector<4xf32>
    %50 = vector.extract_strided_slice %18 {offsets = [1, 1, 0], sizes = [8, 16, 4], strides = [1, 1, 1]} : vector<10x18x4xf32> to vector<8x16x4xf32>
    %51 = vector.shape_cast %49 : vector<4xf32> to vector<1x1x4xf32>
    %52 = vector.broadcast %51 : vector<1x1x4xf32> to vector<8x16x4xf32>
    %53 = arith.mulf %50, %52 : vector<8x16x4xf32>
    %54 = arith.addf %47, %53 : vector<8x16x4xf32>
    %c1_43 = arith.constant 1 : index
    %c2_44 = arith.constant 2 : index
    %c0_45 = arith.constant 0 : index
    %55 = vector.load %arg5[%c1_43, %c2_44, %c0_45] : memref<3x3x4xf32, #tpu.memory_space<vmem>>, vector<1x1x4xf32>
    %56 = vector.shape_cast %55 : vector<1x1x4xf32> to vector<4xf32>
    %57 = vector.extract_strided_slice %18 {offsets = [1, 2, 0], sizes = [8, 16, 4], strides = [1, 1, 1]} : vector<10x18x4xf32> to vector<8x16x4xf32>
    %58 = vector.shape_cast %56 : vector<4xf32> to vector<1x1x4xf32>
    %59 = vector.broadcast %58 : vector<1x1x4xf32> to vector<8x16x4xf32>
    %60 = arith.mulf %57, %59 : vector<8x16x4xf32>
    %61 = arith.addf %54, %60 : vector<8x16x4xf32>
    %c2_46 = arith.constant 2 : index
    %c0_47 = arith.constant 0 : index
    %c0_48 = arith.constant 0 : index
    %62 = vector.load %arg5[%c2_46, %c0_47, %c0_48] : memref<3x3x4xf32, #tpu.memory_space<vmem>>, vector<1x1x4xf32>
    %63 = vector.shape_cast %62 : vector<1x1x4xf32> to vector<4xf32>
    %64 = vector.extract_strided_slice %18 {offsets = [2, 0, 0], sizes = [8, 16, 4], strides = [1, 1, 1]} : vector<10x18x4xf32> to vector<8x16x4xf32>
    %65 = vector.shape_cast %63 : vector<4xf32> to vector<1x1x4xf32>
    %66 = vector.broadcast %65 : vector<1x1x4xf32> to vector<8x16x4xf32>
    %67 = arith.mulf %64, %66 : vector<8x16x4xf32>
    %68 = arith.addf %61, %67 : vector<8x16x4xf32>
    %c2_49 = arith.constant 2 : index
    %c1_50 = arith.constant 1 : index
    %c0_51 = arith.constant 0 : index
    %69 = vector.load %arg5[%c2_49, %c1_50, %c0_51] : memref<3x3x4xf32, #tpu.memory_space<vmem>>, vector<1x1x4xf32>
    %70 = vector.shape_cast %69 : vector<1x1x4xf32> to vector<4xf32>
    %71 = vector.extract_strided_slice %18 {offsets = [2, 1, 0], sizes = [8, 16, 4], strides = [1, 1, 1]} : vector<10x18x4xf32> to vector<8x16x4xf32>
    %72 = vector.shape_cast %70 : vector<4xf32> to vector<1x1x4xf32>
    %73 = vector.broadcast %72 : vector<1x1x4xf32> to vector<8x16x4xf32>
    %74 = arith.mulf %71, %73 : vector<8x16x4xf32>
    %75 = arith.addf %68, %74 : vector<8x16x4xf32>
    %c2_52 = arith.constant 2 : index
    %c2_53 = arith.constant 2 : index
    %c0_54 = arith.constant 0 : index
    %76 = vector.load %arg5[%c2_52, %c2_53, %c0_54] : memref<3x3x4xf32, #tpu.memory_space<vmem>>, vector<1x1x4xf32>
    %77 = vector.shape_cast %76 : vector<1x1x4xf32> to vector<4xf32>
    %78 = vector.extract_strided_slice %18 {offsets = [2, 2, 0], sizes = [8, 16, 4], strides = [1, 1, 1]} : vector<10x18x4xf32> to vector<8x16x4xf32>
    %79 = vector.shape_cast %77 : vector<4xf32> to vector<1x1x4xf32>
    %80 = vector.broadcast %79 : vector<1x1x4xf32> to vector<8x16x4xf32>
    %81 = arith.mulf %78, %80 : vector<8x16x4xf32>
    %82 = arith.addf %75, %81 : vector<8x16x4xf32>
    %c0_55 = arith.constant 0 : index
    %c0_56 = arith.constant 0 : index
    %83 = vector.load %arg6[%c0_55, %c0_56] : memref<1x4xf32, #tpu.memory_space<vmem>>, vector<1x4xf32>
    %84 = vector.shape_cast %83 : vector<1x4xf32> to vector<4xf32>
    %85 = vector.shape_cast %84 : vector<4xf32> to vector<1x1x4xf32>
    %86 = vector.broadcast %85 : vector<1x1x4xf32> to vector<8x16x4xf32>
    %87 = arith.mulf %82, %86 : vector<8x16x4xf32>
    %c0_57 = arith.constant 0 : index
    %c0_58 = arith.constant 0 : index
    %88 = vector.load %arg7[%c0_57, %c0_58] : memref<1x4xf32, #tpu.memory_space<vmem>>, vector<1x4xf32>
    %89 = vector.shape_cast %88 : vector<1x4xf32> to vector<4xf32>
    %90 = vector.shape_cast %89 : vector<4xf32> to vector<1x1x4xf32>
    %91 = vector.broadcast %90 : vector<1x1x4xf32> to vector<8x16x4xf32>
    %92 = arith.addf %87, %91 : vector<8x16x4xf32>
    %cst_59 = arith.constant 0.000000e+00 : f32
    %93 = vector.broadcast %cst_59 : f32 to vector<8x16x4xf32>
    %94 = arith.maximumf %92, %93 : vector<8x16x4xf32>
    %95 = vector.shape_cast %94 : vector<8x16x4xf32> to vector<128x4xf32>
    %96 = arith.truncf %95 : vector<128x4xf32> to vector<128x4xbf16>
    %c0_60 = arith.constant 0 : index
    %c0_61 = arith.constant 0 : index
    %97 = vector.load %arg8[%c0_60, %c0_61] : memref<4x8xbf16, #tpu.memory_space<vmem>>, vector<4x8xbf16>
    %cst_62 = arith.constant dense<0.000000e+00> : vector<128x8xf32>
    %98 = tpu.matmul %96, %97, %cst_62 {dimension_numbers = #tpu.dot_dimension_numbers<[1], [0], [0], [1], [0, 0, 1, 1], [], []>} : vector<128x4xbf16>, vector<4x8xbf16>, vector<128x8xf32> -> vector<128x8xf32>
    %c0_63 = arith.constant 0 : index
    %c0_64 = arith.constant 0 : index
    %99 = vector.load %arg9[%c0_63, %c0_64] : memref<1x8xf32, #tpu.memory_space<vmem>>, vector<1x8xf32>
    %100 = vector.broadcast %99 : vector<1x8xf32> to vector<128x8xf32>
    %101 = arith.mulf %98, %100 : vector<128x8xf32>
    %c0_65 = arith.constant 0 : index
    %c0_66 = arith.constant 0 : index
    %102 = vector.load %arg10[%c0_65, %c0_66] : memref<1x8xf32, #tpu.memory_space<vmem>>, vector<1x8xf32>
    %103 = vector.broadcast %102 : vector<1x8xf32> to vector<128x8xf32>
    %104 = arith.addf %101, %103 : vector<128x8xf32>
    %cst_67 = arith.constant 0.000000e+00 : f32
    %105 = vector.broadcast %cst_67 : f32 to vector<128x8xf32>
    %106 = arith.maximumf %104, %105 : vector<128x8xf32>
    %107 = vector.shape_cast %106 : vector<128x8xf32> to vector<8x16x8xf32>
    %c0_68 = arith.constant 0 : index
    %c0_69 = arith.constant 0 : index
    %c0_70 = arith.constant 0 : index
    %c0_71 = arith.constant 0 : index
    %108 = vector.load %arg11[%c0_68, %c0_69, %c0_70, %c0_71] : memref<1x8x16x8xf32, #tpu.memory_space<vmem>>, vector<1x8x16x8xf32>
    %109 = vector.shape_cast %108 : vector<1x8x16x8xf32> to vector<8x16x8xf32>
    %110 = vector.shape_cast %107 : vector<8x16x8xf32> to vector<1x8x16x8xf32>
    tpu.vector_store %arg11[%c0_68, %c0_69, %c0_70, %c0_71], %110 {strides = array<i32>} : memref<1x8x16x8xf32, #tpu.memory_space<vmem>>, vector<1x8x16x8xf32>,
    return
  }
  func.func @transform_0(%arg0: i32, %arg1: i32) -> (i32, i32, i32, i32) {
    %c8_i32 = arith.constant 8 : i32
    %0 = arith.muli %arg1, %c8_i32 : i32
    %c1_i32 = arith.constant 1 : i32
    %1 = arith.subi %0, %c1_i32 : i32
    %c0_i32 = arith.constant 0 : i32
    %2 = arith.maxsi %1, %c0_i32 : i32
    %c0_i32_0 = arith.constant 0 : i32
    %c0_i32_1 = arith.constant 0 : i32
    %c0_i32_2 = arith.constant 0 : i32
    return %arg0, %2, %c0_i32_0, %c0_i32_1 : i32, i32, i32, i32
  }
  func.func @transform_1(%arg0: i32, %arg1: i32) -> (i32, i32, i32, i32) {
    %c0_i32 = arith.constant 0 : i32
    %c0_i32_0 = arith.constant 0 : i32
    %c0_i32_1 = arith.constant 0 : i32
    return %arg0, %arg1, %c0_i32, %c0_i32_0 : i32, i32, i32, i32
  }
  func.func @transform_2(%arg0: i32, %arg1: i32) -> (i32, i32, i32, i32) {
    %c1_i32 = arith.constant 1 : i32
    %0 = arith.addi %arg1, %c1_i32 : i32
    %c8_i32 = arith.constant 8 : i32
    %1 = arith.muli %0, %c8_i32 : i32
    %c15_i32 = arith.constant 15 : i32
    %2 = arith.minsi %1, %c15_i32 : i32
    %c0_i32 = arith.constant 0 : i32
    %c0_i32_0 = arith.constant 0 : i32
    %c0_i32_1 = arith.constant 0 : i32
    return %arg0, %2, %c0_i32, %c0_i32_0 : i32, i32, i32, i32
  }
  func.func @transform_3(%arg0: i32, %arg1: i32) -> (i32, i32, i32) {
    %c0_i32 = arith.constant 0 : i32
    %c0_i32_0 = arith.constant 0 : i32
    %c0_i32_1 = arith.constant 0 : i32
    %c0_i32_2 = arith.constant 0 : i32
    return %c0_i32, %c0_i32_0, %c0_i32_1 : i32, i32, i32
  }
  func.func @transform_4(%arg0: i32, %arg1: i32) -> (i32, i32) {
    %c0_i32 = arith.constant 0 : i32
    %c0_i32_0 = arith.constant 0 : i32
    %c0_i32_1 = arith.constant 0 : i32
    return %c0_i32, %c0_i32_0 : i32, i32
  }
  func.func @transform_5(%arg0: i32, %arg1: i32) -> (i32, i32) {
    %c0_i32 = arith.constant 0 : i32
    %c0_i32_0 = arith.constant 0 : i32
    %c0_i32_1 = arith.constant 0 : i32
    return %c0_i32, %c0_i32_0 : i32, i32
  }
  func.func @transform_6(%arg0: i32, %arg1: i32) -> (i32, i32) {
    %c0_i32 = arith.constant 0 : i32
    %c0_i32_0 = arith.constant 0 : i32
    %c0_i32_1 = arith.constant 0 : i32
    return %c0_i32, %c0_i32_0 : i32, i32
  }
  func.func @transform_7(%arg0: i32, %arg1: i32) -> (i32, i32) {
    %c0_i32 = arith.constant 0 : i32
    %c0_i32_0 = arith.constant 0 : i32
    %c0_i32_1 = arith.constant 0 : i32
    return %c0_i32, %c0_i32_0 : i32, i32
  }
  func.func @transform_8(%arg0: i32, %arg1: i32) -> (i32, i32) {
    %c0_i32 = arith.constant 0 : i32
    %c0_i32_0 = arith.constant 0 : i32
    %c0_i32_1 = arith.constant 0 : i32
    return %c0_i32, %c0_i32_0 : i32, i32
  }
  func.func @transform_9(%arg0: i32, %arg1: i32) -> (i32, i32, i32, i32) {
    %c0_i32 = arith.constant 0 : i32
    %c0_i32_0 = arith.constant 0 : i32
    %c0_i32_1 = arith.constant 0 : i32
    return %arg0, %arg1, %c0_i32, %c0_i32_0 : i32, i32, i32, i32
  }
}

</mosaic_0001>

<bundles_post_ra>
// kernel: mobilenet_block.1
= control target key start
LH: loop header
LB: loop body
LE: loop exit
PB: predicated region body
PF: predicated region fallthrough
CT: control target
= control target key end

     0   :  { %s2154_s30 = smov 0   ;;  %s2156_s10 = smov 0   ;;  %s3045_s0 = inlined_call_operand.vmem [shape: f32[2,16,16,4], index: 0, kind: input, shape index: {}, may-alias: {0,1,2}]   ;;  %s3046_s1 = inlined_call_operand.vmem [shape: f32[2,16,16,4], index: 1, kind: input, shape index: {}, may-alias: {0,1,2}]   ;;  %s3047_s2 = inlined_call_operand.vmem [shape: f32[2,16,16,4], index: 2, kind: input, shape index: {}, may-alias: {0,1,2}]   ;;  %s3048_s3 = inlined_call_operand.vmem [shape: f32[3,3,4], index: 3, kind: input, shape index: {}]   ;;  %s3049_s4 = inlined_call_operand.vmem [shape: f32[1,4], index: 4, kind: input, shape index: {}]   ;;  %s3050_s5 = inlined_call_operand.vmem [shape: f32[1,4], index: 5, kind: input, shape index: {}]   ;;  %s3051_s6 = inlined_call_operand.vmem [shape: bf16[4,8], index: 6, kind: input, shape index: {}]   ;;  %s3052_s7 = inlined_call_operand.vmem [shape: f32[1,8], index: 7, kind: input, shape index: {}]   ;;  %s3053_s8 = inlined_call_operand.vmem [shape: f32[1,8], index: 8, kind: input, shape index: {}]   ;;  %s3054_s9 = inlined_call_operand.vmem [shape: f32[2,16,16,8], index: 9, kind: output, shape index: {}]  }
   0x1   :  { %s2158_s11 = smov 0   ;;  %s2160_s12 = smov 0  }
   0x2   :  { %s2162_s13 = smov 0  }
   0x3 LB: > { %s28_s14 = sadd.s32 1, %s2093_s11  ;;  %s31_s15 = sadd.s32 1, %s2097_s12  ;;  %s2101_s13 = sphi %s2162_s13, %s19_s13   ;;  %s2097_s12 = sphi %s2160_s12, %s3059_s12   ;;  %s2093_s11 = sphi %s2158_s11, %s3058_s11   ;;  %s2089_s10 = sphi %s2156_s10, %s3057_s10   ;;  %s2085_s30 = sphi %s2154_s30, %s3056_s30  }
   0x4   : > { %p29_p0 = scmp.ge.s32.totalorder %s28_s14, 2  ;;  %p1899_p1 = scmp.ge.s32.totalorder %s2101_s13, 1 }
   0x5   : > { %p373_p2 = scmp.lt.s32.totalorder %s2101_s13, 5 }
   0x6   : > { %s3061_s14 = smov (%p29_p0, %s28_s14), 0  ;;  %s3063_s15 = smov (!%p29_p0, %s31_s15), %s2097_s12 }
   0x7   : > { %p374_p3 = pnand %p1899_p1, %p373_p2  ;;  %p33_p4 = scmp.ge.s32.totalorder %s3063_s15, 2 }
   0x8   : > { %s2190_s18 = sshll.u32 (!%p374_p3), %s2085_s30, 3  ;;  %p449_p5 = scmp.lt.s32.totalorder (!%p374_p3), %s2089_s10, 1 }
   0x9   : > { %s3065_s15 = smov (%p33_p4, %s3063_s15), 0  ;;  %377 = sbr.rel (%p374_p3) target bundleno = 402 (0x192), region = 56 }
   0xa   : > { %p465_p6 = scmp.lt.s32.totalorder (!%p374_p3), %s2190_s18, 15  ;;  %s1901_s21 = sadd.s32 (!%p374_p3), 4294967295, %s2190_s18 }
   0xb   : > { %p447_p7 = scmp.gt.s32.totalorder (!%p374_p3), %s1901_s21, 0  ;;  %p1902_p8 = scmp.lt.s32.totalorder (!%p374_p3), %s1901_s21, 15 }
   0xc   : > { %p525_p9 = scmp.gt.s32.totalorder (!%p374_p3), %s2085_s30, 0  ;;  %s1961_s29 = sadd.s32 (!%p374_p3), 8, %s2190_s18 }
   0xd   : > { %p2278_p10 = scmp.lt.s32.totalorder (!%p374_p3), %s1961_s29, 15  ;;  %p569_p11 = scmp.lt.s32.totalorder (!%p374_p3), %s2085_s30, 1 }
   0xe   : > { %v1543_v0 = vld [vmem:[%s3051_s6] sm:$0x3]  ;;  %vm1568_vm0 = vcmask 1041408   ;;  %vm502_vm1 = vcmask 24576   ;;  %s3067_s10 = smov (!%p449_p5, %s2089_s10), 1  ;;  %v2103_v2 = vmov 0.0  }
   0xf   : > { %1992 = vmatprep.subr.msk.bf16.mxu1 %vm1568_vm0, %v1543_v0  ;;  %v1570_v1 = vsel %vm1568_vm0, %v1543_v0, 0  ;;  %1991 = vmatprep.subr.msk.bf16.mxu0 %vm1568_vm0, %v1543_v0  ;;  %507 = vst.msk [vmem:[#allocation2 + $0x60] sm:$0x1] %vm502_vm1, %v2103_v2  ;;  %508 = vst.msk [vmem:[#allocation2 + $0x78] sm:$0x1] %vm502_vm1, %v2103_v2  ;;  %s466_s19 = scalar_select %p465_p6, %s2190_s18, 15 }
  0x10   : > { %1990 = vmatpush3.bf16.msra.mxu1 %v1570_v1  ;;  %509 = vst.msk [vmem:[#allocation2 + $0x90] sm:$0x1] %vm502_vm1, %v2103_v2  ;;  %517 = vst.msk [vmem:[#allocation2 + $0x71] sm:$0x1] %vm502_vm1, %v2103_v2  ;;  %1972 = vmatpush3.bf16.msra.mxu0 %v1570_v1  ;;  %s2216_s20 = sshll.u32 %s3067_s10, 5  ;;  %vm531_vm2 = vcmask 31744  }
  0x11   : > { %518 = vst.msk [vmem:[#allocation2 + $0x89] sm:$0x1] %vm502_vm1, %v2103_v2  ;;  %519 = vst.msk [vmem:[#allocation2 + $0xa1] sm:$0x1] %vm502_vm1, %v2103_v2  ;;  %s1911_s22 = sshll.u32 %s466_s19, 1  ;;  %vm698_vm3 = vcmask 1046528  }
  0x12   : > { %503 = vst.msk [vmem:[#allocation2] sm:$0x1] %vm502_vm1, %v2103_v2  ;;  %504 = vst.msk [vmem:[#allocation2 + $0x18] sm:$0x1] %vm502_vm1, %v2103_v2  ;;  %s2220_s23 = sadd.s32 %s1911_s22, %s2216_s20  ;;  %v2263_v18 = vld [vmem:[%s3048_s3] ss:$0 sm:$0xff] }
  0x13   : > { %505 = vst.msk [vmem:[#allocation2 + $0x30] sm:$0x1] %vm502_vm1, %v2103_v2  ;;  %506 = vst.msk [vmem:[#allocation2 + $0x48] sm:$0x1] %vm502_vm1, %v2103_v2  ;;  %s1913_s24 = sshll.u32 %s2220_s23, 3  ;;  %vm824_vm4 = vcmask 1045504  }
  0x14   : > { %510 = vst.msk [vmem:[#allocation2 + $0xa8] sm:$0x1] %vm502_vm1, %v2103_v2  ;;  %511 = vst.msk [vmem:[#allocation2 + $0xc0] sm:$0x1] %vm502_vm1, %v2103_v2  ;;  %s2229_s27 = scalar_lea.vmem %s3046_s1, %s1913_s24  ;;  %v2273_v20 = vld [vmem:[%s3048_s3 + $0x1] ss:$0 sm:$0xff] }
  0x15   : > { %512 = vst.msk [vmem:[#allocation2 + $0xd8] sm:$0x1] %vm502_vm1, %v2103_v2  ;;  %513 = vst.msk [vmem:[#allocation2 + $0x11] sm:$0x1] %vm502_vm1, %v2103_v2  ;;  %v540_v3 = vld [vmem:[%s2229_s27 + $0x30] sm:$0xff]  ;;  %v541_v4 = vld [vmem:[%s2229_s27 + $0x38] sm:$0xff] }
  0x16   : > { %514 = vst.msk [vmem:[#allocation2 + $0x29] sm:$0x1] %vm502_vm1, %v2103_v2  ;;  %515 = vst.msk [vmem:[#allocation2 + $0x41] sm:$0x1] %vm502_vm1, %v2103_v2  ;;  %v542_v5 = vld [vmem:[%s2229_s27 + $0x40] sm:$0xff]  ;;  %s448_s28 = scalar_select %p447_p7, %s1901_s21, 0 }
  0x17   : > { %516 = vst.msk [vmem:[#allocation2 + $0x59] sm:$0x1] %vm502_vm1, %v2103_v2  ;;  %520 = vst.msk [vmem:[#allocation2 + $0xb9] sm:$0x1] %vm502_vm1, %v2103_v2  ;;  %v543_v6 = vld [vmem:[%s2229_s27 + $0x48] sm:$0xff]  ;;  %v544_v7 = vld [vmem:[%s2229_s27 + $0x50] sm:$0xff] }
  0x18   : > { %521 = vst.msk [vmem:[#allocation2 + $0xd1] sm:$0x1] %vm502_vm1, %v2103_v2  ;;  %522 = vst.msk [vmem:[#allocation2 + $0xe9] sm:$0x1] %vm502_vm1, %v2103_v2  ;;  %v545_v8 = vld [vmem:[%s2229_s27 + $0x58] sm:$0xff]  ;;  %v546_v9 = vld [vmem:[%s2229_s27 + $0x60] sm:$0xff] }
  0x19   : > { %557 = vst.msk [vmem:[#allocation2 + $0x61] sm:$0xff] %vm531_vm2, %v540_v3  ;;  %558 = vst.msk [vmem:[#allocation2 + $0x69] sm:$0xff] %vm531_vm2, %v541_v4  ;;  %v547_v10 = vld [vmem:[%s2229_s27 + $0x68] sm:$0xff]  ;;  %s3069_s28 = smov (!%p1902_p8, %s448_s28), 15  ;;  %v534_v11 = vld [vmem:[%s2229_s27] sm:$0xff]  ;;  %s3071_s29 = smov (!%p2278_p10, %s1961_s29), 15 }
  0x1a   : > { %559 = vst.msk [vmem:[#allocation2 + $0x79] sm:$0xff] %vm531_vm2, %v542_v5  ;;  %560 = vst.msk [vmem:[#allocation2 + $0x81] sm:$0xff] %vm531_vm2, %v543_v6  ;;  %v535_v12 = vld [vmem:[%s2229_s27 + $0x8] sm:$0xff]  ;;  %v536_v13 = vld [vmem:[%s2229_s27 + $0x10] sm:$0xff]  ;;  %s1907_s10 = sshll.u32 %s3069_s28, 1  ;;  %s3073_s29 = smov (!%p2278_p10, %s3071_s29), 15 }
  0x1b   : > { %561 = vst.msk [vmem:[#allocation2 + $0x91] sm:$0xff] %vm531_vm2, %v544_v7  ;;  %562 = vst.msk [vmem:[#allocation2 + $0x99] sm:$0xff] %vm531_vm2, %v545_v8  ;;  %v537_v14 = vld [vmem:[%s2229_s27 + $0x18] sm:$0xff]  ;;  %v538_v15 = vld [vmem:[%s2229_s27 + $0x20] sm:$0xff]  ;;  %s455_s19 = sadd.s32 %s2216_s20, %s1907_s10  ;;  %s1918_s26 = sshll.u32 %s3073_s29, 1  ;;  %vm1731_vm5 = vcmask 64512  }
  0x1c   : > { %563 = vst.msk [vmem:[#allocation2 + $0xa9] sm:$0xff] %vm531_vm2, %v546_v9  ;;  %564 = vst.msk [vmem:[#allocation2 + $0xb1] sm:$0xff] %vm531_vm2, %v547_v10  ;;  %v539_v16 = vld [vmem:[%s2229_s27 + $0x28] sm:$0xff]  ;;  %v548_v17 = vld [vmem:[%s2229_s27 + $0x70] sm:$0xff]  ;;  %s1909_s25 = sshll.u32 %s455_s19, 3  ;;  %s483_s17 = sadd.s32 %s1918_s26, %s2216_s20 }
  0x1d   : > { %551 = vst.msk [vmem:[#allocation2 + $0x19] sm:$0xff] %vm531_vm2, %v534_v11  ;;  %552 = vst.msk [vmem:[#allocation2 + $0x21] sm:$0xff] %vm531_vm2, %v535_v12  ;;  %v549_v19 = vld [vmem:[%s2229_s27 + $0x78] sm:$0xff]  ;;  %v2285_v21 = vld [vmem:[%s3048_s3 + $0x2] ss:$0 sm:$0xff]  ;;  %s457_s21 = scalar_lea.vmem %s3045_s0, %s1909_s25 }
  0x1e   : > { %553 = vst.msk [vmem:[#allocation2 + $0x31] sm:$0xff] %vm531_vm2, %v536_v13  ;;  %554 = vst.msk [vmem:[#allocation2 + $0x39] sm:$0xff] %vm531_vm2, %v537_v14  ;;  %v2290_v22 = vld [vmem:[%s3048_s3 + $0x4] ss:$0 sm:$0xff]  ;;  %s2035_s22 = scalar_select %p525_p9, 255, 0 }
  0x1f   : > { %555 = vst.msk [vmem:[#allocation2 + $0x49] sm:$0xff] %vm531_vm2, %v538_v15  ;;  %556 = vst.msk [vmem:[#allocation2 + $0x51] sm:$0xff] %vm531_vm2, %v539_v16  ;;  %v2313_v36 = vld [vmem:[%s3048_s3 + $0x5] ss:$0 sm:$0xff]  ;;  %v2338_v52 = vld [vmem:[%s3048_s3 + $0x6] ss:$0 sm:$0xff] }
  0x20   : > { %565 = vst.msk [vmem:[#allocation2 + $0xc1] sm:$0xff] %vm531_vm2, %v548_v17  ;;  %566 = vst.msk [vmem:[#allocation2 + $0xc9] sm:$0xff] %vm531_vm2, %v549_v19  ;;  %v590_v23 = vld [vmem:[#allocation2 + $0x60] sm:$0xff]  ;;  %v591_v24 = vld [vmem:[#allocation2 + $0x68] sm:$0xff]  ;;  %s2041_s10 = scalar_select %p569_p11, 255, 0 }
  0x21   : > { %v592_v25 = vld [vmem:[#allocation2 + $0x70] sm:$0x3]  ;;  %v621_v26 = vmul.f32 %v2263_v18, %v590_v23  ;;  %v622_v27 = vmul.f32 %v2263_v18, %v591_v24  ;;  %v662_v28 = vmul.f32 %v2273_v20, %v590_v23  ;;  %v663_v29 = vmul.f32 %v2273_v20, %v591_v24  ;;  %v2302_v30 = vld [vmem:[#allocation2 + $0x78] sm:$0xff]  ;;  %v2321_v37 = vld [vmem:[#allocation2 + $0x80] sm:$0xff] }
  0x22   : > { %v2304_v31 = vld [vmem:[#allocation2 + $0xa0] sm:$0x3]  ;;  %v664_v32 = vmul.f32 %v2273_v20, %v592_v25  ;;  %v788_v33 = vmul.f32 %v2285_v21, %v590_v23  ;;  %v789_v34 = vmul.f32 %v2285_v21, %v591_v24  ;;  %v790_v35 = vmul.f32 %v2285_v21, %v592_v25  ;;  %v2039_v47 = vld [vmem:[%s457_s21 + $0x8] sm:%s2035_s22]  ;;  %v2359_v63 = vld [vmem:[#allocation2 + $0x90] sm:$0xff] }
  0x23   : > { %v2325_v38 = vmul.f32 %v2273_v20, %v2304_v31  ;;  %v719_v39 = vrot.slane %v662_v28, 1  ;;  %v720_v40 = vrot.slane %v663_v29, 1  ;;  %v911_v41 = vmul.f32 %v2290_v22, %v2302_v30  ;;  %v2036_v46 = vld [vmem:[%s457_s21] sm:%s2035_s22]  ;;  %533 = vst.msk [vmem:[#allocation2 + $0x9] sm:$0xff] %vm531_vm2, %v2039_v47  ;;  %v2345_v53 = vld [vmem:[#allocation2 + $0x88] sm:$0x3] }
  0x24   : > { %v722_v42 = vrot.slane %v664_v32, 1  ;;  %v845_v43 = vrot.slane %v788_v33, 2  ;;  %v846_v44 = vrot.slane %v789_v34, 2  ;;  %v848_v45 = vrot.slane %v790_v35, 2  ;;  %532 = vst.msk [vmem:[#allocation2 + $0x1] sm:$0xff] %vm531_vm2, %v2036_v46  ;;  %s1920_s21 = sshll.u32 %s483_s17, 3  ;;  %s2967_s17 = scalar_lea.vmem %s3054_s9, %s1913_s24 }
  0x25   : > { %v721_v48 = vsel %vm698_vm3, %v719_v39, %v720_v40  ;;  %v732_v49 = vrot.slane %v2325_v38, 1  ;;  %v912_v50 = vmul.f32 %v2290_v22, %v2321_v37  ;;  %v952_v51 = vmul.f32 %v2313_v36, %v2302_v30  ;;  %v2353_v58 = vld [vmem:[%s3048_s3 + $0x8] ss:$0 sm:$0xff]  ;;  %v2373_v8 = vld [vmem:[%s3048_s3 + $0x9] ss:$0 sm:$0xff]  ;;  %v2375_v9 = vld [vmem:[#allocation2 + $0x98] sm:$0xff]  ;;  %s485_s18 = scalar_lea.vmem %s3047_s2, %s1920_s21 }
  0x26   : > { %v723_v54 = vsel %vm698_vm3, %v720_v40, %v722_v42  ;;  %v763_v55 = vadd.f32 %v721_v48, %v621_v26  ;;  %v847_v56 = vsel %vm824_vm4, %v845_v43, %v846_v44  ;;  %v849_v57 = vsel %vm824_vm4, %v846_v44, %v848_v45  ;;  %v2380_v14 = vld [vmem:[%s3048_s3 + $0xa] ss:$0 sm:$0xff]  ;;  %v2042_v33 = vld [vmem:[%s485_s18] sm:%s2041_s10] }
  0x27   : > { %v764_v59 = vadd.f32 %v723_v54, %v622_v27  ;;  %v953_v60 = vmul.f32 %v2313_v36, %v2321_v37  ;;  %v954_v61 = vmul.f32 %v2313_v36, %v2345_v53  ;;  %v1008_v62 = vrot.slane %v952_v51, 1  ;;  %576 = vst.msk [vmem:[#allocation2 + $0xd9] sm:$0xff] %vm531_vm2, %v2042_v33 }
  0x28   : > { %v889_v0 = vadd.f32 %v847_v56, %v763_v55  ;;  %v1077_v1 = vmul.f32 %v2338_v52, %v2302_v30  ;;  %v1078_v2 = vmul.f32 %v2338_v52, %v2321_v37  ;;  %v1079_v3 = vmul.f32 %v2338_v52, %v2345_v53 }
  0x29   : > { %v890_v4 = vadd.f32 %v849_v57, %v764_v59  ;;  %v1009_v5 = vrot.slane %v953_v60, 1  ;;  %v1011_v6 = vrot.slane %v954_v61, 1  ;;  %v1199_v7 = vmul.f32 %v2353_v58, %v2359_v63 }
  0x2a   : > { %v927_v10 = vadd.f32 %v911_v41, %v889_v0  ;;  %v1133_v11 = vrot.slane %v1077_v1, 2  ;;  %v1134_v12 = vrot.slane %v1078_v2, 2  ;;  %v1136_v13 = vrot.slane %v1079_v3, 2  ;;  %v2045_v41 = vld [vmem:[%s485_s18 + $0x8] sm:%s2041_s10]  ;;  %v2420_v0 = vld [vmem:[%s3049_s4] ss:$0 sm:$0xff] }
  0x2b   : > { %v928_v15 = vadd.f32 %v912_v50, %v890_v4  ;;  %v1010_v16 = vsel %vm698_vm3, %v1008_v62, %v1009_v5  ;;  %v1012_v17 = vsel %vm698_vm3, %v1009_v5, %v1011_v6  ;;  %v1200_v19 = vmul.f32 %v2353_v58, %v2375_v9  ;;  %577 = vst.msk [vmem:[#allocation2 + $0xe1] sm:$0xff] %vm531_vm2, %v2045_v41 }
  0x2c   : > { %v1052_v23 = vadd.f32 %v1010_v16, %v927_v10  ;;  %v1135_v24 = vsel %vm824_vm4, %v1133_v11, %v1134_v12  ;;  %v1137_v25 = vsel %vm824_vm4, %v1134_v12, %v1136_v13  ;;  %v1240_v26 = vmul.f32 %v2373_v8, %v2359_v63  ;;  %v2435_v11 = vld [vmem:[%s3050_s5] ss:$0 sm:$0xff] }
  0x2d   : > { %v1053_v27 = vadd.f32 %v1012_v17, %v928_v15  ;;  %v1241_v28 = vmul.f32 %v2373_v8, %v2375_v9  ;;  %v1242_v29 = vmul.f32 %v2373_v8, %v2304_v31  ;;  %v1365_v32 = vmul.f32 %v2380_v14, %v2359_v63 }
  0x2e   : > { %v1177_v34 = vadd.f32 %v1135_v24, %v1052_v23  ;;  %v1296_v35 = vrot.slane %v1240_v26, 1  ;;  %v1366_v39 = vmul.f32 %v2380_v14, %v2375_v9  ;;  %v1367_v40 = vmul.f32 %v2380_v14, %v2304_v31 }
  0x2f   : > { %v1178_v42 = vadd.f32 %v1137_v25, %v1053_v27  ;;  %v1297_v43 = vrot.slane %v1241_v28, 1  ;;  %v1299_v44 = vrot.slane %v1242_v29, 1  ;;  %v1421_v45 = vrot.slane %v1365_v32, 2 }
  0x30   : > { %v1215_v46 = vadd.f32 %v1199_v7, %v1177_v34  ;;  %v1422_v47 = vrot.slane %v1366_v39, 2  ;;  %v1424_v48 = vrot.slane %v1367_v40, 2  ;;  %v623_v50 = vmul.f32 %v2263_v18, %v2302_v30 }
  0x31   : > { %v1216_v51 = vadd.f32 %v1200_v19, %v1178_v42  ;;  %v1298_v54 = vsel %vm698_vm3, %v1296_v35, %v1297_v43  ;;  %v1300_v55 = vsel %vm698_vm3, %v1297_v43, %v1299_v44  ;;  %v624_v56 = vmul.f32 %v2263_v18, %v2321_v37 }
  0x32   : > { %v1340_v57 = vadd.f32 %v1298_v54, %v1215_v46  ;;  %v1423_v59 = vsel %vm824_vm4, %v1421_v45, %v1422_v47  ;;  %v1425_v60 = vsel %vm824_vm4, %v1422_v47, %v1424_v48  ;;  %v665_v61 = vmul.f32 %v2273_v20, %v2302_v30  ;;  %v2459_v54 = vld [vmem:[#allocation2 + $0xa8] sm:$0xff] }
  0x33   : > { %v1341_v62 = vadd.f32 %v1300_v55, %v1216_v51  ;;  %v666_v1 = vmul.f32 %v2273_v20, %v2321_v37  ;;  %v667_v2 = vmul.f32 %v2273_v20, %v2345_v53  ;;  %v791_v3 = vmul.f32 %v2285_v21, %v2302_v30 }
  0x34   : > { %v1465_v4 = vadd.f32 %v1423_v59, %v1340_v57  ;;  %v724_v5 = vrot.slane %v665_v61, 1  ;;  %v792_v6 = vmul.f32 %v2285_v21, %v2321_v37  ;;  %v793_v7 = vmul.f32 %v2285_v21, %v2345_v53  ;;  %v2464_v59 = vld [vmem:[#allocation2 + $0xb0] sm:$0xff] }
  0x35   : > { %v1466_v10 = vadd.f32 %v1425_v60, %v1341_v62  ;;  %v725_v12 = vrot.slane %v666_v1, 1  ;;  %v727_v13 = vrot.slane %v667_v2, 1  ;;  %v850_v15 = vrot.slane %v791_v3, 2  ;;  %v2470_v2 = vld [vmem:[#allocation2 + $0xb8] sm:$0x3] }
  0x36   : > { %v1488_v16 = vmul.f32 %v2420_v0, %v1465_v4  ;;  %v851_v30 = vrot.slane %v792_v6, 2  ;;  %v853_v17 = vrot.slane %v793_v7, 2  ;;  %v913_v19 = vmul.f32 %v2290_v22, %v2359_v63 }
  0x37   : > { %v1489_v37 = vmul.f32 %v2420_v0, %v1466_v10  ;;  %v726_v53 = vsel %vm698_vm3, %v724_v5, %v725_v12  ;;  %v728_v23 = vsel %vm698_vm3, %v725_v12, %v727_v13  ;;  %v914_v24 = vmul.f32 %v2290_v22, %v2375_v9 }
  0x38   : > { %v1511_v25 = vadd.f32 %v2435_v11, %v1488_v16  ;;  %v765_v26 = vadd.f32 %v726_v53, %v623_v50  ;;  %v766_v27 = vadd.f32 %v728_v23, %v624_v56  ;;  %v852_v28 = vsel %vm824_vm4, %v850_v15, %v851_v30 }
  0x39   : > { %v1512_v29 = vadd.f32 %v2435_v11, %v1489_v37  ;;  %v854_v32 = vsel %vm824_vm4, %v851_v30, %v853_v17  ;;  %v955_v33 = vmul.f32 %v2313_v36, %v2359_v63  ;;  %v956_v34 = vmul.f32 %v2313_v36, %v2375_v9 }
  0x3a   : > { %v1527_v35 = vmax.f32 %v1511_v25, 0.0  ;;  %v891_v39 = vadd.f32 %v852_v28, %v765_v26  ;;  %v892_v40 = vadd.f32 %v854_v32, %v766_v27  ;;  %v957_v41 = vmul.f32 %v2313_v36, %v2304_v31  ;;  %v579_v28 = vld [vmem:[#allocation2 + $0x8] sm:$0xff] }
  0x3b   : > { %v1528_v42 = vmax.f32 %v1512_v29, 0.0  ;;  %v1013_v43 = vrot.slane %v955_v33, 1  ;;  %v1014_v44 = vrot.slane %v956_v34, 1  ;;  %v1080_v45 = vmul.f32 %v2338_v52, %v2359_v63  ;;  %v580_v29 = vld [vmem:[#allocation2 + $0x10] sm:$0x3] }
  0x3c   : > { %v929_v46 = vadd.f32 %v913_v19, %v891_v39  ;;  %v930_v47 = vadd.f32 %v914_v24, %v892_v40  ;;  %v1016_v48 = vrot.slane %v957_v41, 1  ;;  %v1081_v50 = vmul.f32 %v2338_v52, %v2375_v9  ;;  %v578_v24 = vld [vmem:[#allocation2] sm:$0xff]  ;;  %v583_v40 = vld [vmem:[#allocation2 + $0x28] sm:$0x3] }
  0x3d   : > { %v1539_v51 = vpack.c.bf16 %v1528_v42, %v1527_v35  ;;  %v1015_v55 = vsel %vm698_vm3, %v1013_v43, %v1014_v44  ;;  %v1082_v56 = vmul.f32 %v2338_v52, %v2304_v31  ;;  %v1138_v57 = vrot.slane %v1080_v45, 2  ;;  %v2491_v41 = vld [vmem:[#allocation2 + $0x40] sm:$0x3] }
  0x3e   : > { %v1017_v60 = vsel %vm698_vm3, %v1014_v44, %v1016_v48  ;;  %v1054_v61 = vadd.f32 %v1015_v55, %v929_v46  ;;  %v1139_v62 = vrot.slane %v1081_v50, 2  ;;  %v1201_v1 = vmul.f32 %v2353_v58, %v2459_v54 }
  0x3f   : > { %1981 = vmatprep.mubr.msk.bf16.mxu1 %vm531_vm2, %v1539_v51  ;;  %v1055_v3 = vadd.f32 %v1017_v60, %v930_v47  ;;  %v1141_v4 = vrot.slane %v1082_v56, 2  ;;  %v1202_v5 = vmul.f32 %v2353_v58, %v2464_v59  ;;  %v1243_v6 = vmul.f32 %v2373_v8, %v2459_v54 }
  0x40   : > { %v1140_v7 = vsel %vm824_vm4, %v1138_v57, %v1139_v62  ;;  %v1244_v10 = vmul.f32 %v2373_v8, %v2464_v59  ;;  %v1245_v12 = vmul.f32 %v2373_v8, %v2470_v2  ;;  %v1368_v13 = vmul.f32 %v2380_v14, %v2459_v54 }
  0x41   : > { %v1142_v15 = vsel %vm824_vm4, %v1139_v62, %v1141_v4  ;;  %v1179_v16 = vadd.f32 %v1140_v7, %v1054_v61  ;;  %v1301_v30 = vrot.slane %v1243_v6, 1  ;;  %v1369_v17 = vmul.f32 %v2380_v14, %v2464_v59 }
  0x42   : > { %v1180_v19 = vadd.f32 %v1142_v15, %v1055_v3  ;;  %v1302_v37 = vrot.slane %v1244_v10, 1  ;;  %v1304_v53 = vrot.slane %v1245_v12, 1  ;;  %v1370_v23 = vmul.f32 %v2380_v14, %v2470_v2 }
  0x43   : > { %v1217_v25 = vadd.f32 %v1201_v1, %v1179_v16  ;;  %v1426_v26 = vrot.slane %v1368_v13, 2  ;;  %v1427_v27 = vrot.slane %v1369_v17, 2  ;;  %v613_v32 = vmul.f32 %v2263_v18, %v578_v24 }
  0x44   : > { %v1218_v33 = vadd.f32 %v1202_v5, %v1180_v19  ;;  %v1303_v34 = vsel %vm698_vm3, %v1301_v30, %v1302_v37  ;;  %v1305_v35 = vsel %vm698_vm3, %v1302_v37, %v1304_v53  ;;  %v1429_v39 = vrot.slane %v1370_v23, 2  ;;  %v2520_v37 = vld [vmem:[#allocation2 + $0x18] sm:$0xff]  ;;  %v2522_v53 = vld [vmem:[#allocation2 + $0x20] sm:$0xff] }
  0x45   : > { %v1342_v42 = vadd.f32 %v1303_v34, %v1217_v25  ;;  %v1428_v43 = vsel %vm824_vm4, %v1426_v26, %v1427_v27  ;;  %v614_v44 = vmul.f32 %v2263_v18, %v579_v28  ;;  %v650_v45 = vmul.f32 %v2273_v20, %v578_v24 }
  0x46   : > { %v1343_v46 = vadd.f32 %v1305_v35, %v1218_v33  ;;  %v1430_v47 = vsel %vm824_vm4, %v1427_v27, %v1429_v39  ;;  %v651_v48 = vmul.f32 %v2273_v20, %v579_v28  ;;  %v652_v50 = vmul.f32 %v2273_v20, %v580_v29 }
  0x47   : > { %v1467_v51 = vadd.f32 %v1428_v43, %v1342_v42  ;;  %v2500_v55 = vmul.f32 %v2273_v20, %v583_v40  ;;  %v2504_v56 = vmul.f32 %v2273_v20, %v2491_v41  ;;  %v699_v57 = vrot.slane %v650_v45, 1 }
  0x48   : > { %v1468_v60 = vadd.f32 %v1430_v47, %v1343_v46  ;;  %v700_v61 = vrot.slane %v651_v48, 1  ;;  %v702_v62 = vrot.slane %v652_v50, 1  ;;  %v776_v1 = vmul.f32 %v2285_v21, %v578_v24  ;;  %v2540_v50 = vld [vmem:[#allocation2 + $0x30] sm:$0xff] }
  0x49   : > { %v1490_v3 = vmul.f32 %v2420_v0, %v1467_v51  ;;  %v707_v4 = vrot.slane %v2500_v55, 1  ;;  %v712_v5 = vrot.slane %v2504_v56, 1  ;;  %v777_v6 = vmul.f32 %v2285_v21, %v579_v28 }
  0x4a   : > { %v1491_v7 = vmul.f32 %v2420_v0, %v1468_v60  ;;  %v701_v10 = vsel %vm698_vm3, %v699_v57, %v700_v61  ;;  %v703_v12 = vsel %vm698_vm3, %v700_v61, %v702_v62  ;;  %v778_v13 = vmul.f32 %v2285_v21, %v580_v29  ;;  %v2543_v62 = vld [vmem:[#allocation2 + $0x38] sm:$0xff] }
  0x4b   : > { %v1513_v15 = vadd.f32 %v2435_v11, %v1490_v3  ;;  %v755_v16 = vadd.f32 %v701_v10, %v613_v32  ;;  %v756_v30 = vadd.f32 %v703_v12, %v614_v44  ;;  %v2517_v17 = vmul.f32 %v2285_v21, %v583_v40 }
  0x4c   : > { %v1514_v19 = vadd.f32 %v2435_v11, %v1491_v7  ;;  %v825_v23 = vrot.slane %v776_v1, 2  ;;  %v826_v24 = vrot.slane %v777_v6, 2  ;;  %v828_v25 = vrot.slane %v778_v13, 2 }
  0x4d   : > { %v1529_v26 = vmax.f32 %v1513_v15, 0.0  ;;  %v833_v27 = vrot.slane %v2517_v17, 2  ;;  %v903_v28 = vmul.f32 %v2290_v22, %v2520_v37  ;;  %v904_v29 = vmul.f32 %v2290_v22, %v2522_v53 }
  0x4e   : > { %v1530_v32 = vmax.f32 %v1514_v19, 0.0  ;;  %v827_v33 = vsel %vm824_vm4, %v825_v23, %v826_v24  ;;  %v829_v34 = vsel %vm824_vm4, %v826_v24, %v828_v25  ;;  %v940_v35 = vmul.f32 %v2313_v36, %v2520_v37 }
  0x4f   : > { %v881_v39 = vadd.f32 %v827_v33, %v755_v16  ;;  %v882_v42 = vadd.f32 %v829_v34, %v756_v30  ;;  %v941_v43 = vmul.f32 %v2313_v36, %v2522_v53  ;;  %v942_v44 = vmul.f32 %v2313_v36, %v583_v40 }
  0x50   : > { %v1540_v45 = vpack.c.bf16 %v1530_v32, %v1529_v26  ;;  %v988_v46 = vrot.slane %v940_v35, 1  ;;  %v1065_v47 = vmul.f32 %v2338_v52, %v2520_v37  ;;  %v1066_v48 = vmul.f32 %v2338_v52, %v2522_v53 }
  0x51   : > { %v919_v51 = vadd.f32 %v903_v28, %v881_v39  ;;  %v920_v57 = vadd.f32 %v904_v29, %v882_v42  ;;  %v989_v60 = vrot.slane %v941_v43, 1  ;;  %v991_v61 = vrot.slane %v942_v44, 1 }
  0x52   : > { %1982 = vmatmul.mubr.msk.bf16.vlgmr.msra.gmra.mxu1 %vm531_vm2, %v1540_v45  ;;  %v1067_v1 = vmul.f32 %v2338_v52, %v583_v40  ;;  %v1113_v3 = vrot.slane %v1065_v47, 2  ;;  %v1114_v6 = vrot.slane %v1066_v48, 2  ;;  %v1191_v7 = vmul.f32 %v2353_v58, %v2540_v50 }
  0x53   : > { %v990_v10 = vsel %vm698_vm3, %v988_v46, %v989_v60  ;;  %v992_v12 = vsel %vm698_vm3, %v989_v60, %v991_v61  ;;  %v1192_v13 = vmul.f32 %v2353_v58, %v2543_v62  ;;  %v1228_v15 = vmul.f32 %v2373_v8, %v2540_v50 }
  0x54   : > { %v1044_v16 = vadd.f32 %v990_v10, %v919_v51  ;;  %v1045_v30 = vadd.f32 %v992_v12, %v920_v57  ;;  %v1115_v19 = vsel %vm824_vm4, %v1113_v3, %v1114_v6  ;;  %v1116_v40 = vrot.slane %v1067_v1, 2 }
  0x55   : > { %v1229_v23 = vmul.f32 %v2373_v8, %v2543_v62  ;;  %v1230_v24 = vmul.f32 %v2373_v8, %v2491_v41  ;;  %v1276_v25 = vrot.slane %v1228_v15, 1  ;;  %v1353_v26 = vmul.f32 %v2380_v14, %v2540_v50 }
  0x56   : > { %v1117_v28 = vsel %vm824_vm4, %v1114_v6, %v1116_v40  ;;  %v1169_v29 = vadd.f32 %v1115_v19, %v1044_v16  ;;  %v1354_v32 = vmul.f32 %v2380_v14, %v2543_v62  ;;  %v1355_v33 = vmul.f32 %v2380_v14, %v2491_v41 }
  0x57   : > { %v1170_v34 = vadd.f32 %v1117_v28, %v1045_v30  ;;  %v1277_v35 = vrot.slane %v1229_v23, 1  ;;  %v1279_v39 = vrot.slane %v1230_v24, 1  ;;  %v1401_v42 = vrot.slane %v1353_v26, 2 }
  0x58   : > { %v1207_v43 = vadd.f32 %v1191_v7, %v1169_v29  ;;  %v1402_v44 = vrot.slane %v1354_v32, 2  ;;  %v1404_v45 = vrot.slane %v1355_v33, 2  ;;  %v615_v46 = vmul.f32 %v2263_v18, %v2520_v37 }
  0x59   : > { %v1208_v47 = vadd.f32 %v1192_v13, %v1170_v34  ;;  %v1278_v48 = vsel %vm698_vm3, %v1276_v25, %v1277_v35  ;;  %v1280_v51 = vsel %vm698_vm3, %v1277_v35, %v1279_v39  ;;  %v616_v57 = vmul.f32 %v2263_v18, %v2522_v53 }
  0x5a   : > { %v1332_v60 = vadd.f32 %v1278_v48, %v1207_v43  ;;  %v1403_v61 = vsel %vm824_vm4, %v1401_v42, %v1402_v44  ;;  %v1405_v1 = vsel %vm824_vm4, %v1402_v44, %v1404_v45  ;;  %v653_v3 = vmul.f32 %v2273_v20, %v2520_v37 }
  0x5b   : > { %v1333_v6 = vadd.f32 %v1280_v51, %v1208_v47  ;;  %v654_v7 = vmul.f32 %v2273_v20, %v2522_v53  ;;  %v779_v10 = vmul.f32 %v2285_v21, %v2520_v37  ;;  %v780_v12 = vmul.f32 %v2285_v21, %v2522_v53 }
  0x5c   : > { %v1457_v13 = vadd.f32 %v1403_v61, %v1332_v60  ;;  %v704_v15 = vrot.slane %v653_v3, 1  ;;  %v905_v16 = vmul.f32 %v2290_v22, %v2540_v50  ;;  %v906_v30 = vmul.f32 %v2290_v22, %v2543_v62 }
  0x5d   : > { %v1458_v19 = vadd.f32 %v1405_v1, %v1333_v6  ;;  %v705_v40 = vrot.slane %v654_v7, 1  ;;  %v830_v23 = vrot.slane %v779_v10, 2  ;;  %v831_v24 = vrot.slane %v780_v12, 2 }
  0x5e   : > { %v1480_v25 = vmul.f32 %v2420_v0, %v1457_v13  ;;  %v943_v37 = vmul.f32 %v2313_v36, %v2540_v50  ;;  %v944_v53 = vmul.f32 %v2313_v36, %v2543_v62  ;;  %v945_v26 = vmul.f32 %v2313_v36, %v2491_v41 }
  0x5f   : > { %v1481_v28 = vmul.f32 %v2420_v0, %v1458_v19  ;;  %v706_v29 = vsel %vm698_vm3, %v704_v15, %v705_v40  ;;  %v708_v32 = vsel %vm698_vm3, %v705_v40, %v707_v4  ;;  %v832_v33 = vsel %vm824_vm4, %v830_v23, %v831_v24  ;;  %v2620_v19 = vld [vmem:[#allocation2 + $0x58] sm:$0x3] }
  0x60   : > { %v1503_v34 = vadd.f32 %v2435_v11, %v1480_v25  ;;  %v757_v35 = vadd.f32 %v706_v29, %v615_v46  ;;  %v758_v39 = vadd.f32 %v708_v32, %v616_v57  ;;  %v834_v42 = vsel %vm824_vm4, %v831_v24, %v833_v27  ;;  %v2610_v27 = vld [vmem:[#allocation2 + $0x48] sm:$0xff]  ;;  %v2612_v57 = vld [vmem:[#allocation2 + $0x50] sm:$0xff] }
  0x61   : > { %v1504_v43 = vadd.f32 %v2435_v11, %v1481_v28  ;;  %v993_v44 = vrot.slane %v943_v37, 1  ;;  %v994_v45 = vrot.slane %v944_v53, 1  ;;  %v996_v47 = vrot.slane %v945_v26, 1 }
  0x62   : > { %v1519_v48 = vmax.f32 %v1503_v34, 0.0  ;;  %v883_v51 = vadd.f32 %v832_v33, %v757_v35  ;;  %v884_v55 = vadd.f32 %v834_v42, %v758_v39  ;;  %v1068_v4 = vmul.f32 %v2338_v52, %v2540_v50 }
  0x63   : > { %v1520_v60 = vmax.f32 %v1504_v43, 0.0  ;;  %v995_v61 = vsel %vm698_vm3, %v993_v44, %v994_v45  ;;  %v997_v46 = vsel %vm698_vm3, %v994_v45, %v996_v47  ;;  %v1069_v17 = vmul.f32 %v2338_v52, %v2543_v62 }
  0x64   : > { %v921_v1 = vadd.f32 %v905_v16, %v883_v51  ;;  %v922_v3 = vadd.f32 %v906_v30, %v884_v55  ;;  %v1070_v6 = vmul.f32 %v2338_v52, %v2491_v41  ;;  %v1118_v7 = vrot.slane %v1068_v4, 2 }
  0x65   : > { %v1535_v10 = vpack.c.bf16 %v1520_v60, %v1519_v48  ;;  %v1119_v12 = vrot.slane %v1069_v17, 2  ;;  %v1193_v13 = vmul.f32 %v2353_v58, %v2610_v27  ;;  %v1194_v15 = vmul.f32 %v2353_v58, %v2612_v57 }
  0x66   : > { %v1046_v40 = vadd.f32 %v995_v61, %v921_v1  ;;  %v1047_v23 = vadd.f32 %v997_v46, %v922_v3  ;;  %v1121_v24 = vrot.slane %v1070_v6, 2  ;;  %v1231_v16 = vmul.f32 %v2373_v8, %v2610_v27 }
  0x67   : > { %1973 = vmatprep.mubr.msk.bf16.mxu0 %vm531_vm2, %v1535_v10  ;;  %v1120_v30 = vsel %vm824_vm4, %v1118_v7, %v1119_v12  ;;  %v1232_v25 = vmul.f32 %v2373_v8, %v2612_v57  ;;  %v1233_v37 = vmul.f32 %v2373_v8, %v2620_v19  ;;  %v1356_v53 = vmul.f32 %v2380_v14, %v2610_v27 }
  0x68   : > { %v1122_v26 = vsel %vm824_vm4, %v1119_v12, %v1121_v24  ;;  %v1171_v28 = vadd.f32 %v1120_v30, %v1046_v40  ;;  %v1281_v29 = vrot.slane %v1231_v16, 1  ;;  %v1357_v32 = vmul.f32 %v2380_v14, %v2612_v57 }
  0x69   : > { %v1172_v33 = vadd.f32 %v1122_v26, %v1047_v23  ;;  %v1282_v34 = vrot.slane %v1232_v25, 1  ;;  %v1284_v35 = vrot.slane %v1233_v37, 1  ;;  %v1358_v39 = vmul.f32 %v2380_v14, %v2620_v19 }
  0x6a   : > { %v1209_v42 = vadd.f32 %v1193_v13, %v1171_v28  ;;  %v1406_v43 = vrot.slane %v1356_v53, 2  ;;  %v1407_v44 = vrot.slane %v1357_v32, 2  ;;  %v625_v45 = vmul.f32 %v2263_v18, %v2359_v63 }
  0x6b   : > { %v1210_v47 = vadd.f32 %v1194_v15, %v1172_v33  ;;  %v1283_v48 = vsel %vm698_vm3, %v1281_v29, %v1282_v34  ;;  %v1285_v51 = vsel %vm698_vm3, %v1282_v34, %v1284_v35  ;;  %v1409_v55 = vrot.slane %v1358_v39, 2 }
  0x6c   : > { %v1334_v4 = vadd.f32 %v1283_v48, %v1209_v42  ;;  %v1408_v60 = vsel %vm824_vm4, %v1406_v43, %v1407_v44  ;;  %v626_v61 = vmul.f32 %v2263_v18, %v2375_v9  ;;  %v668_v46 = vmul.f32 %v2273_v20, %v2359_v63 }
  0x6d   : > { %v1335_v17 = vadd.f32 %v1285_v51, %v1210_v47  ;;  %v1410_v1 = vsel %vm824_vm4, %v1407_v44, %v1409_v55  ;;  %v669_v3 = vmul.f32 %v2273_v20, %v2375_v9  ;;  %v794_v6 = vmul.f32 %v2285_v21, %v2359_v63 }
  0x6e   : > { %v1459_v7 = vadd.f32 %v1408_v60, %v1334_v4  ;;  %v729_v10 = vrot.slane %v668_v46, 1  ;;  %v795_v12 = vmul.f32 %v2285_v21, %v2375_v9  ;;  %v796_v13 = vmul.f32 %v2285_v21, %v2304_v31 }
  0x6f   : > { %v1460_v15 = vadd.f32 %v1410_v1, %v1335_v17  ;;  %v730_v40 = vrot.slane %v669_v3, 1  ;;  %v855_v23 = vrot.slane %v794_v6, 2  ;;  %v915_v24 = vmul.f32 %v2290_v22, %v2459_v54  ;;  %v2683_v3 = vld [vmem:[#allocation2 + $0xc0] sm:$0xff]  ;;  %v2685_v6 = vld [vmem:[#allocation2 + $0xc8] sm:$0xff] }
  0x70   : > { %v1482_v16 = vmul.f32 %v2420_v0, %v1459_v7  ;;  %v856_v30 = vrot.slane %v795_v12, 2  ;;  %v858_v25 = vrot.slane %v796_v13, 2  ;;  %v916_v63 = vmul.f32 %v2290_v22, %v2464_v59 }
  0x71   : > { %v1483_v37 = vmul.f32 %v2420_v0, %v1460_v15  ;;  %v731_v9 = vsel %vm698_vm3, %v729_v10, %v730_v40  ;;  %v733_v31 = vsel %vm698_vm3, %v730_v40, %v732_v49  ;;  %v958_v53 = vmul.f32 %v2313_v36, %v2459_v54  ;;  %v2688_v15 = vld [vmem:[#allocation2 + $0xd0] sm:$0x3] }
  0x72   : > { %v1505_v26 = vadd.f32 %v2435_v11, %v1482_v16  ;;  %v767_v28 = vadd.f32 %v731_v9, %v625_v45  ;;  %v768_v29 = vadd.f32 %v733_v31, %v626_v61  ;;  %v857_v32 = vsel %vm824_vm4, %v855_v23, %v856_v30 }
  0x73   : > { %v1506_v33 = vadd.f32 %v2435_v11, %v1483_v37  ;;  %v859_v34 = vsel %vm824_vm4, %v856_v30, %v858_v25  ;;  %v959_v35 = vmul.f32 %v2313_v36, %v2464_v59  ;;  %v960_v38 = vmul.f32 %v2313_v36, %v2470_v2 }
  0x74   : > { %v1521_v49 = vmax.f32 %v1505_v26, 0.0  ;;  %v893_v39 = vadd.f32 %v857_v32, %v767_v28  ;;  %v894_v42 = vadd.f32 %v859_v34, %v768_v29  ;;  %v1018_v43 = vrot.slane %v958_v53, 1 }
  0x75   : > { %v1522_v44 = vmax.f32 %v1506_v33, 0.0  ;;  %v1019_v47 = vrot.slane %v959_v35, 1  ;;  %v1021_v45 = vrot.slane %v960_v38, 1  ;;  %v1083_v48 = vmul.f32 %v2338_v52, %v2459_v54 }
  0x76   : > { %v931_v51 = vadd.f32 %v915_v24, %v893_v39  ;;  %v932_v55 = vadd.f32 %v916_v63, %v894_v42  ;;  %v1084_v4 = vmul.f32 %v2338_v52, %v2464_v59  ;;  %v1085_v60 = vmul.f32 %v2338_v52, %v2470_v2 }
  0x77   : > { %v1536_v61 = vpack.c.bf16 %v1522_v44, %v1521_v49  ;;  %v1020_v46 = vsel %vm698_vm3, %v1018_v43, %v1019_v47  ;;  %v1022_v17 = vsel %vm698_vm3, %v1019_v47, %v1021_v45  ;;  %v1143_v1 = vrot.slane %v1083_v48, 2 }
  0x78   : > { %v1056_v7 = vadd.f32 %v1020_v46, %v931_v51  ;;  %v1057_v10 = vadd.f32 %v1022_v17, %v932_v55  ;;  %v1144_v12 = vrot.slane %v1084_v4, 2  ;;  %v1146_v13 = vrot.slane %v1085_v60, 2 }
  0x79   : > { %1974 = vmatmul.mubr.msk.bf16.vlgmr.msra.gmra.mxu0 %vm531_vm2, %v1536_v61  ;;  %v1203_v40 = vmul.f32 %v2353_v58, %v2683_v3  ;;  %v1204_v23 = vmul.f32 %v2353_v58, %v2685_v6  ;;  %v1246_v24 = vmul.f32 %v2373_v8, %v2683_v3  ;;  %v1247_v16 = vmul.f32 %v2373_v8, %v2685_v6 }
  0x7a   : > { %v1145_v30 = vsel %vm824_vm4, %v1143_v1, %v1144_v12  ;;  %v1147_v25 = vsel %vm824_vm4, %v1144_v12, %v1146_v13  ;;  %v1248_v63 = vmul.f32 %v2373_v8, %v2688_v15  ;;  %v1371_v37 = vmul.f32 %v2380_v14, %v2683_v3 }
  0x7b   : > { %v1181_v9 = vadd.f32 %v1145_v30, %v1056_v7  ;;  %v1182_v31 = vadd.f32 %v1147_v25, %v1057_v10  ;;  %v1306_v53 = vrot.slane %v1246_v24, 1  ;;  %v1307_v26 = vrot.slane %v1247_v16, 1 }
  0x7c   : > { %v1309_v28 = vrot.slane %v1248_v63, 1  ;;  %v1372_v29 = vmul.f32 %v2380_v14, %v2685_v6  ;;  %v1373_v32 = vmul.f32 %v2380_v14, %v2688_v15  ;;  %v1431_v33 = vrot.slane %v1371_v37, 2 }
  0x7d   : > { %v1219_v34 = vadd.f32 %v1203_v40, %v1181_v9  ;;  %v1220_v35 = vadd.f32 %v1204_v23, %v1182_v31  ;;  %v1308_v38 = vsel %vm698_vm3, %v1306_v53, %v1307_v26  ;;  %v627_v47 = vmul.f32 %v2263_v18, %v2459_v54 }
  0x7e   : > { %v1310_v49 = vsel %vm698_vm3, %v1307_v26, %v1309_v28  ;;  %v1432_v39 = vrot.slane %v1372_v29, 2  ;;  %v1434_v42 = vrot.slane %v1373_v32, 2  ;;  %v628_v45 = vmul.f32 %v2263_v18, %v2464_v59  ;;  %v605_v29 = vld [vmem:[#allocation2 + $0xd8] sm:$0xff]  ;;  %v606_v32 = vld [vmem:[#allocation2 + $0xe0] sm:$0xff] }
  0x7f   : > { %v1344_v43 = vadd.f32 %v1308_v38, %v1219_v34  ;;  %v1345_v44 = vadd.f32 %v1310_v49, %v1220_v35  ;;  %v671_v55 = vmul.f32 %v2273_v20, %v2459_v54  ;;  %v672_v4 = vmul.f32 %v2273_v20, %v2464_v59 }
  0x80   : > { %v1433_v48 = vsel %vm824_vm4, %v1431_v33, %v1432_v39  ;;  %v1435_v51 = vsel %vm824_vm4, %v1432_v39, %v1434_v42  ;;  %v673_v46 = vmul.f32 %v2273_v20, %v2470_v2  ;;  %v797_v17 = vmul.f32 %v2285_v21, %v2459_v54 }
  0x81   : > { %v1469_v60 = vadd.f32 %v1433_v48, %v1344_v43  ;;  %v1470_v61 = vadd.f32 %v1435_v51, %v1345_v44  ;;  %v734_v1 = vrot.slane %v671_v55, 1  ;;  %v735_v18 = vrot.slane %v672_v4, 1  ;;  %v607_v48 = vld [vmem:[#allocation2 + $0xe8] sm:$0x3] }
  0x82   : > { %v798_v7 = vmul.f32 %v2285_v21, %v2464_v59  ;;  %v799_v10 = vmul.f32 %v2285_v21, %v2470_v2  ;;  %v737_v40 = vrot.slane %v673_v46, 1  ;;  %v860_v23 = vrot.slane %v797_v17, 2 }
  0x83   : > { %v1492_v12 = vmul.f32 %v2420_v0, %v1469_v60  ;;  %v1493_v13 = vmul.f32 %v2420_v0, %v1470_v61  ;;  %v736_v24 = vsel %vm698_vm3, %v734_v1, %v735_v18  ;;  %v917_v54 = vmul.f32 %v2290_v22, %v2683_v3 }
  0x84   : > { %v861_v20 = vrot.slane %v798_v7, 2  ;;  %v863_v16 = vrot.slane %v799_v10, 2  ;;  %v738_v25 = vsel %vm698_vm3, %v735_v18, %v737_v40  ;;  %v769_v21 = vadd.f32 %v736_v24, %v627_v47 }
  0x85   : > { %v1515_v30 = vadd.f32 %v2435_v11, %v1492_v12  ;;  %v1516_v59 = vadd.f32 %v2435_v11, %v1493_v13  ;;  %v770_v2 = vadd.f32 %v738_v25, %v628_v45  ;;  %v918_v9 = vmul.f32 %v2290_v22, %v2685_v6 }
  0x86   : > { %v862_v63 = vsel %vm824_vm4, %v860_v23, %v861_v20  ;;  %v864_v37 = vsel %vm824_vm4, %v861_v20, %v863_v16  ;;  %v961_v28 = vmul.f32 %v2313_v36, %v2683_v3  ;;  %v962_v34 = vmul.f32 %v2313_v36, %v2685_v6  ;;  %v2768_v16 = vld [vmem:[%s3048_s3] ss:$0 sm:$0xff] }
  0x87   : > { %v1531_v31 = vmax.f32 %v1515_v30, 0.0  ;;  %v1532_v53 = vmax.f32 %v1516_v59, 0.0  ;;  %v895_v26 = vadd.f32 %v862_v63, %v769_v21  ;;  %v896_v33 = vadd.f32 %v864_v37, %v770_v2  ;;  %v2779_v37 = vld [vmem:[%s3048_s3 + $0x1] ss:$0 sm:$0xff] }
  0x88   : > { %v963_v35 = vmul.f32 %v2313_v36, %v2688_v15  ;;  %v1086_v38 = vmul.f32 %v2338_v52, %v2683_v3  ;;  %v1023_v39 = vrot.slane %v961_v28, 1  ;;  %v1087_v42 = vmul.f32 %v2338_v52, %v2685_v6 }
  0x89   : > { %v1541_v49 = vpack.c.bf16 %v1532_v53, %v1531_v31  ;;  %v933_v22 = vadd.f32 %v917_v54, %v895_v26  ;;  %v934_v43 = vadd.f32 %v918_v9, %v896_v33  ;;  %v1024_v44 = vrot.slane %v962_v34, 1  ;;  %v2790_v33 = vld [vmem:[%s3048_s3 + $0x2] ss:$0 sm:$0xff] }
  0x8a   : > { %v1026_v47 = vrot.slane %v963_v35, 1  ;;  %v1088_v45 = vmul.f32 %v2338_v52, %v2688_v15  ;;  %v1148_v51 = vrot.slane %v1086_v38, 2  ;;  %v1149_v36 = vrot.slane %v1087_v42, 2 }
  0x8b   : > { %1985 = vmatprep.mubr.msk.bf16.mxu1 %vm531_vm2, %v1541_v49  ;;  %v1205_v55 = vmul.f32 %v2353_v58, %v605_v29  ;;  %v1206_v3 = vmul.f32 %v2353_v58, %v606_v32  ;;  %v1025_v4 = vsel %vm698_vm3, %v1023_v39, %v1024_v44  ;;  %v1249_v61 = vmul.f32 %v2373_v8, %v605_v29 }
  0x8c   : > { %v1027_v60 = vsel %vm698_vm3, %v1024_v44, %v1026_v47  ;;  %v1151_v6 = vrot.slane %v1088_v45, 2  ;;  %v1058_v46 = vadd.f32 %v1025_v4, %v933_v22  ;;  %v1150_v52 = vsel %vm824_vm4, %v1148_v51, %v1149_v36  ;;  %v2801_v44 = vld [vmem:[%s3048_s3 + $0x4] ss:$0 sm:$0xff] }
  0x8d   : > { %v1059_v17 = vadd.f32 %v1027_v60, %v934_v43  ;;  %v1250_v15 = vmul.f32 %v2373_v8, %v606_v32  ;;  %v1251_v18 = vmul.f32 %v2373_v8, %v607_v48  ;;  %v1311_v7 = vrot.slane %v1249_v61, 1 }
  0x8e   : > { %v1152_v1 = vsel %vm824_vm4, %v1149_v36, %v1151_v6  ;;  %v1374_v58 = vmul.f32 %v2380_v14, %v605_v29  ;;  %v1183_v10 = vadd.f32 %v1150_v52, %v1058_v46  ;;  %v1375_v40 = vmul.f32 %v2380_v14, %v606_v32  ;;  %v2819_v6 = vld [vmem:[%s3048_s3 + $0x5] ss:$0 sm:$0xff]  ;;  %v2831_v52 = vld [vmem:[%s3048_s3 + $0x6] ss:$0 sm:$0xff] }
  0x8f   : > { %v1184_v12 = vadd.f32 %v1152_v1, %v1059_v17  ;;  %v1312_v13 = vrot.slane %v1250_v15, 1  ;;  %v1314_v23 = vrot.slane %v1251_v18, 1  ;;  %v1376_v24 = vmul.f32 %v2380_v14, %v607_v48 }
  0x90   : > { %v1436_v20 = vrot.slane %v1374_v58, 2  ;;  %v617_v8 = vmul.f32 %v2768_v16, %v2540_v50  ;;  %v1221_v54 = vadd.f32 %v1205_v55, %v1183_v10  ;;  %v1437_v25 = vrot.slane %v1375_v40, 2 }
  0x91   : > { %v1222_v30 = vadd.f32 %v1206_v3, %v1184_v12  ;;  %v1313_v59 = vsel %vm698_vm3, %v1311_v7, %v1312_v13  ;;  %v1315_v21 = vsel %vm698_vm3, %v1312_v13, %v1314_v23  ;;  %v1439_v2 = vrot.slane %v1376_v24, 2 }
  0x92   : > { %v618_v63 = vmul.f32 %v2768_v16, %v2543_v62  ;;  %v656_v9 = vmul.f32 %v2779_v37, %v2540_v50  ;;  %v1346_v31 = vadd.f32 %v1313_v59, %v1221_v54  ;;  %v1438_v26 = vsel %vm824_vm4, %v1436_v20, %v1437_v25 }
  0x93   : > { %v1347_v53 = vadd.f32 %v1315_v21, %v1222_v30  ;;  %v657_v28 = vmul.f32 %v2779_v37, %v2543_v62  ;;  %v1440_v29 = vsel %vm824_vm4, %v1437_v25, %v1439_v2  ;;  %v782_v34 = vmul.f32 %v2790_v33, %v2540_v50  ;;  %v2841_v25 = vld [vmem:[#allocation2 + $0x60] sm:$0xff]  ;;  %v2846_v21 = vld [vmem:[%s3048_s3 + $0x8] ss:$0 sm:$0xff] }
  0x94   : > { %v709_v32 = vrot.slane %v656_v9, 1  ;;  %v783_v35 = vmul.f32 %v2790_v33, %v2543_v62  ;;  %v1471_v38 = vadd.f32 %v1438_v26, %v1346_v31  ;;  %v784_v39 = vmul.f32 %v2790_v33, %v2491_v41 }
  0x95   : > { %v1472_v49 = vadd.f32 %v1440_v29, %v1347_v53  ;;  %v710_v22 = vrot.slane %v657_v28, 1  ;;  %v835_v42 = vrot.slane %v782_v34, 2  ;;  %v907_v47 = vmul.f32 %v2801_v44, %v2610_v27  ;;  %v2851_v53 = vld [vmem:[#allocation2 + $0x68] sm:$0xff] }
  0x96   : > { %v836_v43 = vrot.slane %v783_v35, 2  ;;  %v908_v50 = vmul.f32 %v2801_v44, %v2612_v57  ;;  %v1494_v62 = vmul.f32 %v2420_v0, %v1471_v38  ;;  %v838_v3 = vrot.slane %v784_v39, 2  ;;  %v2859_v29 = vld [vmem:[%s3048_s3 + $0x9] ss:$0 sm:$0xff]  ;;  %v2865_v35 = vld [vmem:[#allocation2 + $0x70] sm:$0x3] }
  0x97   : > { %v1495_v45 = vmul.f32 %v2420_v0, %v1472_v49  ;;  %v711_v48 = vsel %vm698_vm3, %v709_v32, %v710_v22  ;;  %v713_v41 = vsel %vm698_vm3, %v710_v22, %v712_v5  ;;  %v946_v61 = vmul.f32 %v2819_v6, %v2610_v27 }
  0x98   : > { %v759_v51 = vadd.f32 %v711_v48, %v617_v8  ;;  %v760_v36 = vadd.f32 %v713_v41, %v618_v63  ;;  %v837_v55 = vsel %vm824_vm4, %v835_v42, %v836_v43  ;;  %v1517_v4 = vadd.f32 %v2435_v11, %v1494_v62  ;;  %v2875_v42 = vld [vmem:[%s3048_s3 + $0xa] ss:$0 sm:$0xff] }
  0x99   : > { %v1518_v60 = vadd.f32 %v2435_v11, %v1495_v45  ;;  %v947_v56 = vmul.f32 %v2819_v6, %v2612_v57  ;;  %v839_v5 = vsel %vm824_vm4, %v836_v43, %v838_v3  ;;  %v948_v17 = vmul.f32 %v2819_v6, %v2620_v19 }
  0x9a   : > { %v885_v46 = vadd.f32 %v837_v55, %v759_v51  ;;  %v1071_v15 = vmul.f32 %v2831_v52, %v2610_v27  ;;  %v1533_v1 = vmax.f32 %v1517_v4, 0.0  ;;  %v886_v7 = vadd.f32 %v839_v5, %v760_v36 }
  0x9b   : > { %v1534_v18 = vmax.f32 %v1518_v60, 0.0  ;;  %v998_v58 = vrot.slane %v946_v61, 1  ;;  %v999_v12 = vrot.slane %v947_v56, 1  ;;  %v1001_v13 = vrot.slane %v948_v17, 1 }
  0x9c   : > { %v923_v10 = vadd.f32 %v907_v47, %v885_v46  ;;  %v1072_v40 = vmul.f32 %v2831_v52, %v2612_v57  ;;  %v924_v24 = vadd.f32 %v908_v50, %v886_v7  ;;  %v1073_v20 = vmul.f32 %v2831_v52, %v2620_v19 }
  0x9d   : > { %v1542_v23 = vpack.c.bf16 %v1534_v18, %v1533_v1  ;;  %v1123_v8 = vrot.slane %v1071_v15, 2  ;;  %v1000_v54 = vsel %vm698_vm3, %v998_v58, %v999_v12  ;;  %v1002_v30 = vsel %vm698_vm3, %v999_v12, %v1001_v13 }
  0x9e   : > { %v1124_v59 = vrot.slane %v1072_v40, 2  ;;  %v1195_v2 = vmul.f32 %v2846_v21, %v2841_v25  ;;  %v1048_v63 = vadd.f32 %v1000_v54, %v923_v10  ;;  %v1049_v9 = vadd.f32 %v1002_v30, %v924_v24 }
  0x9f   : > { %1986 = vmatmul.mubr.msk.bf16.gmra.mxu1 %vm531_vm2, %v1542_v23  ;;  %v1126_v31 = vrot.slane %v1073_v20, 2  ;;  %v1196_v26 = vmul.f32 %v2851_v53, %v2846_v21  ;;  %v1234_v32 = vmul.f32 %v2859_v29, %v2841_v25  ;;  %v1235_v34 = vmul.f32 %v2859_v29, %v2851_v53 }
  0xa0   : > { %v1125_v28 = vsel %vm824_vm4, %v1123_v8, %v1124_v59  ;;  %v1236_v38 = vmul.f32 %v2865_v35, %v2859_v29  ;;  %v1359_v39 = vmul.f32 %v2841_v25, %v2380_v14  ;;  %v1360_v43 = vmul.f32 %v2875_v42, %v2851_v53 }
  0xa1   : > { %v1127_v49 = vsel %vm824_vm4, %v1124_v59, %v1126_v31  ;;  %v1173_v22 = vadd.f32 %v1125_v28, %v1048_v63  ;;  %v1286_v50 = vrot.slane %v1234_v32, 1  ;;  %v1287_v62 = vrot.slane %v1235_v34, 1 }
  0xa2   : > { %v1174_v47 = vadd.f32 %v1127_v49, %v1049_v9  ;;  %v1289_v45 = vrot.slane %v1236_v38, 1  ;;  %v1361_v41 = vmul.f32 %v2875_v42, %v2865_v35  ;;  %v1411_v51 = vrot.slane %v1359_v39, 2 }
  0xa3   : > { %v1211_v48 = vadd.f32 %v1195_v2, %v1173_v22  ;;  %v1412_v36 = vrot.slane %v1360_v43, 2  ;;  %v1288_v14 = vsel %vm698_vm3, %v1286_v50, %v1287_v62  ;;  %v619_v4 = vmul.f32 %v2768_v16, %v2610_v27 }
  0xa4   : > { %v1212_v55 = vadd.f32 %v1196_v26, %v1174_v47  ;;  %v1290_v3 = vsel %vm698_vm3, %v1287_v62, %v1289_v45  ;;  %v1414_v56 = vrot.slane %v1361_v41, 2  ;;  %v620_v5 = vmul.f32 %v2768_v16, %v2612_v57 }
  0xa5   : > { %v1336_v60 = vadd.f32 %v1288_v14, %v1211_v48  ;;  %v1413_v61 = vsel %vm824_vm4, %v1411_v51, %v1412_v36  ;;  %v659_v17 = vmul.f32 %v2779_v37, %v2610_v27  ;;  %v660_v15 = vmul.f32 %v2779_v37, %v2612_v57  ;;  %v2058_v51 = vld [vmem:[#allocation2 + $0x78] sm:$0xff] }
  0xa6   : > { %v1337_v46 = vadd.f32 %v1290_v3, %v1212_v55  ;;  %v661_v1 = vmul.f32 %v2779_v37, %v2620_v19  ;;  %v1415_v18 = vsel %vm824_vm4, %v1412_v36, %v1414_v56  ;;  %v785_v58 = vmul.f32 %v2790_v33, %v2610_v27  ;;  %v2059_v3 = vld [vmem:[#allocation2 + $0x80] sm:$0xff] }
  0xa7   : > { %v1461_v7 = vadd.f32 %v1413_v61, %v1336_v60  ;;  %v786_v10 = vmul.f32 %v2790_v33, %v2612_v57  ;;  %v714_v12 = vrot.slane %v659_v17, 1  ;;  %v715_v13 = vrot.slane %v660_v15, 1  ;;  %v2060_v60 = vld [vmem:[#allocation2 + $0x88] sm:$0x3] }
  0xa8   : > { %v1462_v16 = vadd.f32 %v1415_v18, %v1337_v46  ;;  %v717_v40 = vrot.slane %v661_v1, 1  ;;  %v787_v24 = vmul.f32 %v2790_v33, %v2620_v19  ;;  %v840_v20 = vrot.slane %v785_v58, 2 }
  0xa9   : > { %v1484_v23 = vmul.f32 %v2420_v0, %v1461_v7  ;;  %v841_v37 = vrot.slane %v786_v10, 2  ;;  %v716_v54 = vsel %vm698_vm3, %v714_v12, %v715_v13  ;;  %v909_v57 = vmul.f32 %v2841_v25, %v2801_v44 }
  0xaa   : > { %v1485_v8 = vmul.f32 %v2420_v0, %v1462_v16  ;;  %v718_v27 = vsel %vm698_vm3, %v715_v13, %v717_v40  ;;  %v761_v59 = vadd.f32 %v716_v54, %v619_v4  ;;  %v843_v19 = vrot.slane %v787_v24, 2 }
  0xab   : > { %v1507_v30 = vadd.f32 %v2435_v11, %v1484_v23  ;;  %v762_v2 = vadd.f32 %v718_v27, %v620_v5  ;;  %v842_v63 = vsel %vm824_vm4, %v840_v20, %v841_v37  ;;  %v910_v33 = vmul.f32 %v2851_v53, %v2801_v44 }
  0xac   : > { %v1508_v9 = vadd.f32 %v2435_v11, %v1485_v8  ;;  %v949_v0 = vmul.f32 %v2841_v25, %v2819_v6  ;;  %v887_v26 = vadd.f32 %v842_v63, %v761_v59  ;;  %v950_v28 = vmul.f32 %v2851_v53, %v2819_v6  ;;  %v2062_v59 = vld [vmem:[%s3050_s5] ss:$0 sm:$0xff] }
  0xad   : > { %v1523_v31 = vmax.f32 %v1507_v30, 0.0  ;;  %v951_v32 = vmul.f32 %v2865_v35, %v2819_v6  ;;  %v844_v38 = vsel %vm824_vm4, %v841_v37, %v843_v19  ;;  %v1074_v11 = vmul.f32 %v2841_v25, %v2831_v52 }
  0xae   : > { %v1524_v34 = vmax.f32 %v1508_v9, 0.0  ;;  %v1003_v49 = vrot.slane %v949_v0, 1  ;;  %v888_v22 = vadd.f32 %v844_v38, %v762_v2  ;;  %v925_v44 = vadd.f32 %v909_v57, %v887_v26  ;;  %v2952_v0 = vld [vmem:[%s3052_s7] ss:$0 sm:$0xff] }
  0xaf   : > { %v1004_v39 = vrot.slane %v950_v28, 1  ;;  %v1006_v43 = vrot.slane %v951_v32, 1  ;;  %v1075_v50 = vmul.f32 %v2851_v53, %v2831_v52  ;;  %v1076_v62 = vmul.f32 %v2865_v35, %v2831_v52  ;;  %v2957_v26 = vld [vmem:[%s3053_s8] ss:$0 sm:$0xff] }
  0xb0   : > { %v1537_v47 = vpack.c.bf16 %v1524_v34, %v1523_v31  ;;  %v1128_v45 = vrot.slane %v1074_v11, 2  ;;  %v926_v6 = vadd.f32 %v910_v33, %v888_v22  ;;  %v1197_v25 = vmul.f32 %v2058_v51, %v2846_v21 }
  0xb1   : > { %v1005_v48 = vsel %vm698_vm3, %v1003_v49, %v1004_v39  ;;  %v1007_v41 = vsel %vm698_vm3, %v1004_v39, %v1006_v43  ;;  %v1129_v55 = vrot.slane %v1075_v50, 2  ;;  %v1131_v14 = vrot.slane %v1076_v62, 2 }
  0xb2   : > { %1977 = vmatprep.mubr.msk.bf16.mxu0 %vm531_vm2, %v1537_v47  ;;  %v1050_v36 = vadd.f32 %v1005_v48, %v925_v44  ;;  %v1198_v53 = vmul.f32 %v2059_v3, %v2846_v21  ;;  %v1051_v4 = vadd.f32 %v1007_v41, %v926_v6  ;;  %v1237_v52 = vmul.f32 %v2058_v51, %v2859_v29 }
  0xb3   : > { %v1238_v35 = vmul.f32 %v2059_v3, %v2859_v29  ;;  %v1239_v61 = vmul.f32 %v2060_v60, %v2859_v29  ;;  %v1130_v56 = vsel %vm824_vm4, %v1128_v45, %v1129_v55  ;;  %v1132_v5 = vsel %vm824_vm4, %v1129_v55, %v1131_v14 }
  0xb4   : > { %v1362_v46 = vmul.f32 %v2058_v51, %v2875_v42  ;;  %v1363_v17 = vmul.f32 %v2059_v3, %v2875_v42  ;;  %v1175_v15 = vadd.f32 %v1130_v56, %v1050_v36  ;;  %v1176_v1 = vadd.f32 %v1132_v5, %v1051_v4 }
  0xb5   : > { %v1291_v18 = vrot.slane %v1237_v52, 1  ;;  %v1292_v21 = vrot.slane %v1238_v35, 1  ;;  %v1294_v7 = vrot.slane %v1239_v61, 1  ;;  %v1364_v58 = vmul.f32 %v2060_v60, %v2875_v42  ;;  %v2061_v42 = vld [vmem:[%s3049_s4] ss:$0 sm:$0xff] }
  0xb6   : > { %v1416_v10 = vrot.slane %v1362_v46, 2  ;;  %v1417_v16 = vrot.slane %v1363_v17, 2  ;;  %v1213_v12 = vadd.f32 %v1197_v25, %v1175_v15  ;;  %v1214_v13 = vadd.f32 %v1198_v53, %v1176_v1 }
  0xb7   : > { %v1293_v29 = vsel %vm698_vm3, %v1291_v18, %v1292_v21  ;;  %v1295_v40 = vsel %vm698_vm3, %v1292_v21, %v1294_v7  ;;  %v1419_v24 = vrot.slane %v1364_v58, 2 }
  0xb8   : > { %v1418_v23 = vsel %vm824_vm4, %v1416_v10, %v1417_v16  ;;  %v1338_v20 = vadd.f32 %v1293_v29, %v1213_v12  ;;  %v1339_v37 = vadd.f32 %v1295_v40, %v1214_v13 }
  0xb9   : > { %v1420_v8 = vsel %vm824_vm4, %v1417_v16, %v1419_v24 }
  0xba   : > { %v1463_v54 = vadd.f32 %v1418_v23, %v1338_v20  ;;  %v1464_v27 = vadd.f32 %v1420_v8, %v1339_v37 }
  0xbc   : > { %v1486_v57 = vmul.f32 %v2061_v42, %v1463_v54  ;;  %v1487_v30 = vmul.f32 %v2061_v42, %v1464_v27 }
  0xbe   : > { %v1509_v2 = vadd.f32 %v2062_v59, %v1486_v57  ;;  %v1510_v63 = vadd.f32 %v2062_v59, %v1487_v30 }
  0xc0   : > { %v1525_v9 = vmax.f32 %v1509_v2, 0.0  ;;  %v1526_v19 = vmax.f32 %v1510_v63, 0.0 }
  0xc2   : > { %v1538_v33 = vpack.c.bf16 %v1526_v19, %v1525_v9 }
  0xc4   : > { %1978 = vmatmul.mubr.msk.bf16.gmra.mxu0 %vm531_vm2, %v1538_v33 }
 0x112   : > { %v1983_v31 = vpop.f32.mrf.mxu1 }
 0x113   : > { %v1686_v28 = vmul.f32 %v1983_v31, %v2952_v0 }
 0x114   : > { %v1638_v32 = vpop.f32.mrf.mxu1 }
 0x115   : > { %v1709_v34 = vadd.f32 %v2957_v26, %v1686_v28  ;;  %v1684_v38 = vmul.f32 %v2952_v0, %v1638_v32 }
 0x116   : > { %v1984_v49 = vpop.f32.mrf.mxu1 }
 0x117   : > { %v1725_v11 = vmax.f32 %v1709_v34, 0.0  ;;  %v1707_v22 = vadd.f32 %v2957_v26, %v1684_v38  ;;  %v1687_v44 = vmul.f32 %v1984_v49, %v2952_v0 }
 0x118   : > { %v1641_v39 = vpop.f32.mrf.mxu1 }
 0x119   : > { %1742 = vst.msk [vmem:[%s2967_s17 + $0x50] sm:$0xff] %vm1731_vm5, %v1725_v11  ;;  %v1723_v43 = vmax.f32 %v1707_v22, 0.0  ;;  %v1710_v47 = vadd.f32 %v2957_v26, %v1687_v44  ;;  %v1685_v50 = vmul.f32 %v2952_v0, %v1641_v39 }
 0x11b   : > { %1740 = vst.msk [vmem:[%s2967_s17 + $0x40] sm:$0xff] %vm1731_vm5, %v1723_v43  ;;  %v1726_v62 = vmax.f32 %v1710_v47, 0.0  ;;  %v1708_v45 = vadd.f32 %v2957_v26, %v1685_v50 }
 0x11d   : > { %1743 = vst.msk [vmem:[%s2967_s17 + $0x58] sm:$0xff] %vm1731_vm5, %v1726_v62  ;;  %v1724_v6 = vmax.f32 %v1708_v45, 0.0 }
 0x11f   : > { %1741 = vst.msk [vmem:[%s2967_s17 + $0x48] sm:$0xff] %vm1731_vm5, %v1724_v6 }
 0x139   : > { %v1975_v48 = vpop.f32.mrf.mxu0 }
 0x13a   : > { %v1678_v41 = vmul.f32 %v1975_v48, %v2952_v0 }
 0x13b   : > { %v1606_v51 = vpop.f32.mrf.mxu0 }
 0x13c   : > { %v1701_v25 = vadd.f32 %v2957_v26, %v1678_v41  ;;  %v1676_v36 = vmul.f32 %v2952_v0, %v1606_v51 }
 0x13d   : > { %v1976_v55 = vpop.f32.mrf.mxu0 }
 0x13e   : > { %v1717_v14 = vmax.f32 %v1701_v25, 0.0  ;;  %v1699_v3 = vadd.f32 %v2957_v26, %v1676_v36  ;;  %v1679_v53 = vmul.f32 %v1976_v55, %v2952_v0 }
 0x13f   : > { %v1609_v4 = vpop.f32.mrf.mxu0 }
 0x140   : > { %1734 = vst.msk [vmem:[%s2967_s17 + $0x10] sm:$0xff] %vm1731_vm5, %v1717_v14  ;;  %v1715_v52 = vmax.f32 %v1699_v3, 0.0  ;;  %v1702_v35 = vadd.f32 %v2957_v26, %v1679_v53  ;;  %v1677_v60 = vmul.f32 %v2952_v0, %v1609_v4 }
 0x142   : > { %1732 = vst.msk [vmem:[%s2967_s17] sm:$0xff] %vm1731_vm5, %v1715_v52  ;;  %v1718_v61 = vmax.f32 %v1702_v35, 0.0  ;;  %v1700_v56 = vadd.f32 %v2957_v26, %v1677_v60 }
 0x144   : > { %1735 = vst.msk [vmem:[%s2967_s17 + $0x18] sm:$0xff] %vm1731_vm5, %v1718_v61  ;;  %v1716_v5 = vmax.f32 %v1700_v56, 0.0 }
 0x146   : > { %1733 = vst.msk [vmem:[%s2967_s17 + $0x8] sm:$0xff] %vm1731_vm5, %v1716_v5 }
 0x15f   : > { %v1987_v46 = vpop.f32.mrf.mxu1 }
 0x160   : > { %v1690_v17 = vmul.f32 %v1987_v46, %v2952_v0 }
 0x161   : > { %v1654_v15 = vpop.f32.mrf.mxu1 }
 0x162   : > { %v1713_v1 = vadd.f32 %v2957_v26, %v1690_v17  ;;  %v1688_v18 = vmul.f32 %v2952_v0, %v1654_v15 }
 0x163   : > { %v1988_v21 = vpop.f32.mrf.mxu1 }
 0x164   : > { %v1729_v7 = vmax.f32 %v1713_v1, 0.0  ;;  %v1711_v58 = vadd.f32 %v2957_v26, %v1688_v18  ;;  %v1691_v10 = vmul.f32 %v1988_v21, %v2952_v0 }
 0x165   : > { %v1657_v16 = vpop.f32.mrf.mxu1 }
 0x166   : > { %1746 = vst.msk [vmem:[%s2967_s17 + $0x70] sm:$0xff] %vm1731_vm5, %v1729_v7  ;;  %v1727_v12 = vmax.f32 %v1711_v58, 0.0  ;;  %v1714_v13 = vadd.f32 %v2957_v26, %v1691_v10  ;;  %v1689_v29 = vmul.f32 %v2952_v0, %v1657_v16 }
 0x168   : > { %1744 = vst.msk [vmem:[%s2967_s17 + $0x60] sm:$0xff] %vm1731_vm5, %v1727_v12  ;;  %v1730_v40 = vmax.f32 %v1714_v13, 0.0  ;;  %v1712_v23 = vadd.f32 %v2957_v26, %v1689_v29 }
 0x16a   : > { %1747 = vst.msk [vmem:[%s2967_s17 + $0x78] sm:$0xff] %vm1731_vm5, %v1730_v40  ;;  %v1728_v24 = vmax.f32 %v1712_v23, 0.0 }
 0x16c   : > { %1745 = vst.msk [vmem:[%s2967_s17 + $0x68] sm:$0xff] %vm1731_vm5, %v1728_v24 }
 0x184   : > { %v1979_v20 = vpop.f32.mrf.mxu0 }
 0x185   : > { %v1682_v37 = vmul.f32 %v1979_v20, %v2952_v0 }
 0x186   : > { %v1622_v8 = vpop.f32.mrf.mxu0 }
 0x187   : > { %v1705_v54 = vadd.f32 %v2957_v26, %v1682_v37  ;;  %v1680_v27 = vmul.f32 %v2952_v0, %v1622_v8 }
 0x188   : > { %v1980_v42 = vpop.f32.mrf.mxu0 }
 0x189   : > { %v1721_v57 = vmax.f32 %v1705_v54, 0.0  ;;  %v1703_v30 = vadd.f32 %v2957_v26, %v1680_v27  ;;  %v1683_v59 = vmul.f32 %v1980_v42, %v2952_v0 }
 0x18a   : > { %v1625_v2 = vpop.f32.mrf.mxu0 }
 0x18b   : > { %1738 = vst.msk [vmem:[%s2967_s17 + $0x30] sm:$0xff] %vm1731_vm5, %v1721_v57  ;;  %v1719_v63 = vmax.f32 %v1703_v30, 0.0  ;;  %v1706_v9 = vadd.f32 %v2957_v26, %v1683_v59  ;;  %v1681_v19 = vmul.f32 %v2952_v0, %v1625_v2 }
 0x18d   : > { %1736 = vst.msk [vmem:[%s2967_s17 + $0x20] sm:$0xff] %vm1731_vm5, %v1719_v63  ;;  %v1722_v33 = vmax.f32 %v1706_v9, 0.0  ;;  %v1704_v31 = vadd.f32 %v2957_v26, %v1681_v19 }
 0x18f   : > { %1739 = vst.msk [vmem:[%s2967_s17 + $0x38] sm:$0xff] %vm1731_vm5, %v1722_v33  ;;  %v1720_v28 = vmax.f32 %v1704_v31, 0.0 }
 0x191   : > { %1737 = vst.msk [vmem:[%s2967_s17 + $0x28] sm:$0xff] %vm1731_vm5, %v1720_v28 }
 0x192 PF: > { %s19_s13 = sadd.s32 1, %s2101_s13   ;;  %s3056_s30 = smov %s2093_s11 }
 0x193   : > { %p16_p12 = scmp.ge.s32.totalorder %s19_s13, 6   ;;  %s3057_s10 = smov %s2097_s12 }
 0x194   : > { %s3058_s11 = smov %s3061_s14  ;;  %s3059_s12 = smov %s3065_s15 }
 0x195   :  { %18 = sbr.rel (!%p16_p12) target bundleno = 3 (0x3), region = 96 }

</bundles_post_ra>
